<compile_context>
chip_gen: v5e
topology: v5e:2x2
jax: 0.10.0
libtpu: 0.0.40
codegen_flags: <defaults>
</compile_context>

<pallas_src>
import functools

import jax
import jax.numpy as jnp
from jax.experimental import pallas as pl
from jax.experimental.pallas import tpu as pltpu

_NEG_SLOPE = 0.2
_M_INIT = -1e30      # online-softmax running-max init
_MASK = -2e30        # non-edge logit fill; strictly < _M_INIT so exp(mask - m) == 0 exactly


def _round_up(v, m):
    return (v + m - 1) // m * m


def _pick_tile(n_pad, candidates=(512, 256, 128)):
    # n_pad is always a multiple of 128, so 128 always divides.
    for c in candidates:
        if n_pad % c == 0:
            return c
    return n_pad


# ----------------------------------------------------------------------------
# Kernel 1: augmented projection  haug = x_pad @ w_aug   (bf16 MXU, f32 accumulate)
# ----------------------------------------------------------------------------
def _project_kernel(x_ref, w_ref, o_ref):
    o_ref[...] = jnp.dot(
        x_ref[...], w_ref[...], preferred_element_type=jnp.float32
    ).astype(o_ref.dtype)


def gat_project(x_pad, w_aug, *, tr):
    n_pad, in_pad = x_pad.shape
    hp = w_aug.shape[1]
    return pl.pallas_call(
        _project_kernel,
        out_shape=jax.ShapeDtypeStruct((n_pad, hp), jnp.bfloat16),
        grid_spec=pltpu.PrefetchScalarGridSpec(
            num_scalar_prefetch=0,
            grid=(n_pad // tr,),
            in_specs=[
                pl.BlockSpec((tr, in_pad), lambda r: (r, 0)),
                pl.BlockSpec((in_pad, hp), lambda r: (0, 0)),   # weights resident
            ],
            out_specs=pl.BlockSpec((tr, hp), lambda r: (r, 0)),
        ),
        compiler_params=pltpu.CompilerParams(dimension_semantics=("parallel",)),
    )(x_pad, w_aug)


# ----------------------------------------------------------------------------
# Kernel 2: tiled masked online-softmax aggregation + bias + ReLU
# ----------------------------------------------------------------------------
def _gat_attention_kernel(edst_ref, esrc_ref, hcol_ref, adj_ref, bias_ref, o_ref,
                          m_scr, l_scr, acc_scr):
    j = pl.program_id(1)

    @pl.when(j == 0)
    def _init():
        m_scr[...] = jnp.full(m_scr.shape, _M_INIT, jnp.float32)
        l_scr[...] = jnp.zeros(l_scr.shape, jnp.float32)
        acc_scr[...] = jnp.zeros(acc_scr.shape, jnp.float32)

    # logit[i, j] = e_dst[i] + e_src[j] for edge j -> i (pure broadcast add, no transpose).
    s = edst_ref[...] + esrc_ref[...]                      # (Tm,1)+(1,Tn) -> (Tm,Tn) f32
    s = jnp.where(s > 0, s, s * _NEG_SLOPE)                # LeakyReLU(0.2)
    s = jnp.where(adj_ref[...] != 0, s, _MASK)             # mask non-edges (int8 adjacency)

    m_prev = m_scr[...]
    m_new = jnp.maximum(m_prev, jnp.max(s, axis=-1, keepdims=True))
    corr = jnp.exp(m_prev - m_new)
    p = jnp.exp(s - m_new)                                 # masked entries underflow to 0
    l_scr[...] = corr * l_scr[...] + jnp.sum(p, axis=-1, keepdims=True)
    acc_scr[...] = corr * acc_scr[...] + jnp.dot(
        p.astype(hcol_ref.dtype), hcol_ref[...], preferred_element_type=jnp.float32)
    m_scr[...] = m_new

    @pl.when(j == pl.num_programs(1) - 1)
    def _finalize():
        # Self-loops guarantee every row has >= 1 valid entry, so denom > 0.
        inv = pl.reciprocal(l_scr[...], approx=True)
        out = acc_scr[...] * inv + bias_ref[...]
        o_ref[...] = jnp.maximum(out, 0.0).astype(o_ref.dtype)   # fused ReLU


def gat_attention(haug, e_dst, e_src, adj, bias_pad, *, tm, tn):
    n_pad, hp = haug.shape
    grid = (n_pad // tm, n_pad // tn)
    return pl.pallas_call(
        _gat_attention_kernel,
        out_shape=jax.ShapeDtypeStruct((n_pad, hp), haug.dtype),
        grid_spec=pltpu.PrefetchScalarGridSpec(
            num_scalar_prefetch=0,
            grid=grid,
            in_specs=[
                pl.BlockSpec((tm, 1), lambda i, j: (i, 0)),    # e_dst column (target rows)
                pl.BlockSpec((1, tn), lambda i, j: (0, j)),    # e_src row (source cols)
                pl.BlockSpec((tn, hp), lambda i, j: (j, 0)),   # h of source nodes (bf16)
                pl.BlockSpec((tm, tn), lambda i, j: (i, j)),   # int8 adjacency tile
                pl.BlockSpec((1, hp), lambda i, j: (0, 0)),    # bias (resident)
            ],
            out_specs=pl.BlockSpec((tm, hp), lambda i, j: (i, 0)),  # revisited across j
            scratch_shapes=[
                pltpu.VMEM((tm, 1), jnp.float32),    # running max
                pltpu.VMEM((tm, 1), jnp.float32),    # running denom
                pltpu.VMEM((tm, hp), jnp.float32),   # running weighted-sum accumulator
            ],
        ),
        compiler_params=pltpu.CompilerParams(
            dimension_semantics=("parallel", "arbitrary")),
    )(e_dst, e_src, haug, adj, bias_pad)


# ----------------------------------------------------------------------------
# Forward pass glue
# ----------------------------------------------------------------------------
def _augment_weights(w, a_src, a_dst, in_pad, hp):
    """w_aug lanes: [0:H) = W, H = W@a_dst^T (e_dst), H+1 = W@a_src^T (e_src), rest 0."""
    fin, h = w.shape
    w_aug = jnp.zeros((in_pad, hp), jnp.float32)
    w_aug = w_aug.at[:fin, :h].set(w)
    w_aug = w_aug.at[:fin, h].set((w @ a_dst.T)[:, 0])
    w_aug = w_aug.at[:fin, h + 1].set((w @ a_src.T)[:, 0])
    return w_aug.astype(jnp.bfloat16)


@functools.partial(jax.jit, static_argnums=(4,))
def gat_forward(x, edge_index, batch, params, num_graphs):
    n, fin = x.shape
    n_pad = _round_up(max(n, 128), 128)
    tm = tn = tr = _pick_tile(n_pad)

    # Dense adjacency adj[i, j] = 1 iff edge j -> i, as int8 (4x less DMA than f32),
    # with self-loops on every row (including padded rows) so no softmax row is empty.
    src, dst = edge_index[0], edge_index[1]
    adj = jnp.zeros((n_pad, n_pad), jnp.int8).at[dst, src].set(jnp.int8(1))
    diag = jnp.arange(n_pad)
    adj = adj.at[diag, diag].set(jnp.int8(1))

    fp = _round_up(fin, 128)
    h = jnp.zeros((n_pad, fp), jnp.float32).at[:n, :fin].set(x).astype(jnp.bfloat16)

    hidden = None
    for (w, a_src, a_dst, b) in params["gat_layers"]:
        hidden = w.shape[1]
        hp = _round_up(hidden + 2, 128)           # lane-dense feature padding
        in_pad = h.shape[1]                       # zero rows beyond real in_dim kill aux lanes

        w_aug = _augment_weights(w, a_src, a_dst, in_pad, hp)
        bias_pad = jnp.zeros((1, hp), jnp.float32).at[:, :hidden].set(b)

        haug = gat_project(h, w_aug, tr=tr)                               # (n_pad, hp) bf16
        e_dst = haug[:, hidden:hidden + 1].astype(jnp.float32)            # (n_pad, 1)
        e_src = haug[:, hidden + 1].astype(jnp.float32).reshape(1, n_pad)  # (1, n_pad)
        h = gat_attention(haug, e_dst, e_src, adj, bias_pad, tm=tm, tn=tn)

    # global_mean_pool + Dropout(eval = identity) + final Linear: tiny, plain XLA.
    h_nodes = h[:n, :hidden].astype(jnp.float32)
    onehot = (batch[None, :] == jnp.arange(num_graphs)[:, None]).astype(jnp.float32)
    counts = jnp.sum(onehot, axis=1, keepdims=True)
    pool = onehot / jnp.maximum(counts, 1.0)
    pooled = pool @ h_nodes
    return pooled @ params["lin_w"] + params["lin_b"]


# ----------------------------------------------------------------------------
# Deterministic parameter init + example run
# ----------------------------------------------------------------------------
def init_params(key, input_dim, hidden_dim, output_dim, num_layers):
    params = {"gat_layers": []}
    dims = [input_dim] + [hidden_dim] * (num_layers - 1)
    for i in range(num_layers - 1):
        fin, fout = dims[i], dims[i + 1]
        key, k1, k2, k3 = jax.random.split(key, 4)
        scale = 1.0 / jnp.sqrt(jnp.float32(fin))
        w = jax.random.normal(k1, (fin, fout), jnp.float32) * scale
        a_src = jax.random.normal(k2, (1, fout), jnp.float32) * 0.1
        a_dst = jax.random.normal(k3, (1, fout), jnp.float32) * 0.1
        bias = jnp.zeros((1, fout), jnp.float32)
        params["gat_layers"].append((w, a_src, a_dst, bias))
    key, k1, k2 = jax.random.split(key, 3)
    scale = 1.0 / jnp.sqrt(jnp.float32(hidden_dim))
    params["lin_w"] = jax.random.normal(k1, (hidden_dim, output_dim), jnp.float32) * scale
    params["lin_b"] = (jax.random.uniform(k2, (1, output_dim), jnp.float32) - 0.5) * 2 * scale
    return params


if __name__ == "__main__":
    INPUT_DIM, HIDDEN_DIM, OUTPUT_DIM, NUM_LAYERS = 8, 32, 4, 3
    N_NODES, N_EDGES, N_GRAPHS = 16, 40, 2

    key = jax.random.PRNGKey(0)
    key, kx, ks, kd = jax.random.split(key, 4)

    x = jax.random.normal(kx, (N_NODES, INPUT_DIM), jnp.float32)
    src = jax.random.randint(ks, (N_EDGES,), 0, N_NODES, jnp.int32)
    dst = jax.random.randint(kd, (N_EDGES,), 0, N_NODES, jnp.int32)
    edge_index = jnp.stack([src, dst], axis=0)           # (2, E)
    batch = jnp.concatenate(
        [jnp.zeros((N_NODES // 2,), jnp.int32), jnp.ones((N_NODES // 2,), jnp.int32)]
    )                                                     # (N,)

    params = init_params(key, INPUT_DIM, HIDDEN_DIM, OUTPUT_DIM, NUM_LAYERS)

    out = gat_forward(x, edge_index, batch, params, N_GRAPHS)
    out = jax.block_until_ready(out)
    assert out.shape == (N_GRAPHS, OUTPUT_DIM)
    assert bool(jnp.all(jnp.isfinite(out)))
    print("KERNEL_OK")
</pallas_src>

<mosaic_0001>
module attributes {stable_mosaic.version = 11 : i64} {
  func.func @_project_kernel(%arg0: i32, %arg1: memref<128x128xbf16, #tpu.memory_space<vmem>>, %arg2: memref<128x128xbf16, #tpu.memory_space<vmem>>, %arg3: memref<128x128xbf16, #tpu.memory_space<vmem>>) attributes {dimension_semantics = [#tpu.dimension_semantics<parallel>], iteration_bounds = array<i64: 1>, scalar_prefetch = 0 : i64, scratch_operands = 0 : i64, tpu.core_type = #tpu.core_type<tc>, window_params = [{transform_indices = @transform_0, window_bounds = array<i64: 128, 128>}, {pipeline_mode = #tpu.pipeline_mode<synchronous>, transform_indices = @transform_1, window_bounds = array<i64: 128, 128>}, {transform_indices = @transform_2, window_bounds = array<i64: 128, 128>}]} {
    %c0 = arith.constant 0 : index
    %c0_0 = arith.constant 0 : index
    %0 = vector.load %arg1[%c0, %c0_0] : memref<128x128xbf16, #tpu.memory_space<vmem>>, vector<128x128xbf16>
    %c0_1 = arith.constant 0 : index
    %c0_2 = arith.constant 0 : index
    %1 = vector.load %arg2[%c0_1, %c0_2] : memref<128x128xbf16, #tpu.memory_space<vmem>>, vector<128x128xbf16>
    %cst = arith.constant dense<0.000000e+00> : vector<128x128xf32>
    %2 = tpu.matmul %0, %1, %cst {dimension_numbers = #tpu.dot_dimension_numbers<[1], [0], [0], [1], [0, 0, 1, 1], [], []>} : vector<128x128xbf16>, vector<128x128xbf16>, vector<128x128xf32> -> vector<128x128xf32>
    %3 = arith.truncf %2 : vector<128x128xf32> to vector<128x128xbf16>
    %c0_3 = arith.constant 0 : index
    %c0_4 = arith.constant 0 : index
    %4 = vector.load %arg3[%c0_3, %c0_4] : memref<128x128xbf16, #tpu.memory_space<vmem>>, vector<128x128xbf16>
    tpu.vector_store %arg3[%c0_3, %c0_4], %3 {strides = array<i32>} : memref<128x128xbf16, #tpu.memory_space<vmem>>, vector<128x128xbf16>,
    return
  }
  func.func @transform_0(%arg0: i32) -> (i32, i32) {
    %c0_i32 = arith.constant 0 : i32
    %c0_i32_0 = arith.constant 0 : i32
    return %arg0, %c0_i32 : i32, i32
  }
  func.func @transform_1(%arg0: i32) -> (i32, i32) {
    %c0_i32 = arith.constant 0 : i32
    %c0_i32_0 = arith.constant 0 : i32
    %c0_i32_1 = arith.constant 0 : i32
    return %c0_i32, %c0_i32_0 : i32, i32
  }
  func.func @transform_2(%arg0: i32) -> (i32, i32) {
    %c0_i32 = arith.constant 0 : i32
    %c0_i32_0 = arith.constant 0 : i32
    return %arg0, %c0_i32 : i32, i32
  }
}

module attributes {stable_mosaic.version = 11 : i64} {
  func.func @_gat_attention_kernel(%arg0: i32, %arg1: i32, %arg2: memref<128x1xf32, #tpu.memory_space<vmem>>, %arg3: memref<1x128xf32, #tpu.memory_space<vmem>>, %arg4: memref<128x128xbf16, #tpu.memory_space<vmem>>, %arg5: memref<128x128xi8, #tpu.memory_space<vmem>>, %arg6: memref<1x128xf32, #tpu.memory_space<vmem>>, %arg7: memref<128x128xbf16, #tpu.memory_space<vmem>>, %arg8: memref<128x1xf32, #tpu.memory_space<vmem>>, %arg9: memref<128x1xf32, #tpu.memory_space<vmem>>, %arg10: memref<128x128xf32, #tpu.memory_space<vmem>>) attributes {dimension_semantics = [#tpu.dimension_semantics<parallel>, #tpu.dimension_semantics<arbitrary>], iteration_bounds = array<i64: 1, 1>, scalar_prefetch = 0 : i64, scratch_operands = 3 : i64, tpu.core_type = #tpu.core_type<tc>, window_params = [{transform_indices = @transform_0, window_bounds = array<i64: 128, 1>}, {transform_indices = @transform_1, window_bounds = array<i64: 1, 128>}, {transform_indices = @transform_2, window_bounds = array<i64: 128, 128>}, {transform_indices = @transform_3, window_bounds = array<i64: 128, 128>}, {pipeline_mode = #tpu.pipeline_mode<synchronous>, transform_indices = @transform_4, window_bounds = array<i64: 1, 128>}, {transform_indices = @transform_5, window_bounds = array<i64: 128, 128>}]} {
    %c0_i32 = arith.constant 0 : i32
    %0 = arith.cmpi eq, %arg1, %c0_i32 : i32
    %1 = arith.extui %0 : i1 to i32
    %c0_i32_0 = arith.constant 0 : i32
    %2 = arith.cmpi ne, %1, %c0_i32_0 : i32
    scf.if %2 {
      %cst_27 = arith.constant -1.000000e+30 : f32
      %45 = vector.broadcast %cst_27 : f32 to vector<128x1xf32>
      %c0_28 = arith.constant 0 : index
      %c0_29 = arith.constant 0 : index
      %46 = vector.load %arg8[%c0_28, %c0_29] : memref<128x1xf32, #tpu.memory_space<vmem>>, vector<128x1xf32>
      tpu.vector_store %arg8[%c0_28, %c0_29], %45 {strides = array<i32>} : memref<128x1xf32, #tpu.memory_space<vmem>>, vector<128x1xf32>,
      %cst_30 = arith.constant 0.000000e+00 : f32
      %47 = vector.broadcast %cst_30 : f32 to vector<128x1xf32>
      %c0_31 = arith.constant 0 : index
      %c0_32 = arith.constant 0 : index
      %48 = vector.load %arg9[%c0_31, %c0_32] : memref<128x1xf32, #tpu.memory_space<vmem>>, vector<128x1xf32>
      tpu.vector_store %arg9[%c0_31, %c0_32], %47 {strides = array<i32>} : memref<128x1xf32, #tpu.memory_space<vmem>>, vector<128x1xf32>,
      %cst_33 = arith.constant 0.000000e+00 : f32
      %49 = vector.broadcast %cst_33 : f32 to vector<128x128xf32>
      %c0_34 = arith.constant 0 : index
      %c0_35 = arith.constant 0 : index
      %50 = vector.load %arg10[%c0_34, %c0_35] : memref<128x128xf32, #tpu.memory_space<vmem>>, vector<128x128xf32>
      tpu.vector_store %arg10[%c0_34, %c0_35], %49 {strides = array<i32>} : memref<128x128xf32, #tpu.memory_space<vmem>>, vector<128x128xf32>,
    } else {
    }
    %c0 = arith.constant 0 : index
    %c0_1 = arith.constant 0 : index
    %3 = vector.load %arg2[%c0, %c0_1] : memref<128x1xf32, #tpu.memory_space<vmem>>, vector<128x1xf32>
    %c0_2 = arith.constant 0 : index
    %c0_3 = arith.constant 0 : index
    %4 = vector.load %arg3[%c0_2, %c0_3] : memref<1x128xf32, #tpu.memory_space<vmem>>, vector<1x128xf32>
    %5 = vector.broadcast %3 : vector<128x1xf32> to vector<128x128xf32>
    %6 = vector.broadcast %4 : vector<1x128xf32> to vector<128x128xf32>
    %7 = arith.addf %5, %6 : vector<128x128xf32>
    %cst = arith.constant 0.000000e+00 : f32
    %8 = vector.broadcast %cst : f32 to vector<128x128xf32>
    %9 = arith.cmpf ogt, %7, %8 : vector<128x128xf32>
    %cst_4 = arith.constant 2.000000e-01 : f32
    %10 = vector.broadcast %cst_4 : f32 to vector<128x128xf32>
    %11 = arith.mulf %7, %10 : vector<128x128xf32>
    %12 = arith.select %9, %7, %11 : vector<128x128xi1>, vector<128x128xf32>
    %c0_5 = arith.constant 0 : index
    %c0_6 = arith.constant 0 : index
    %13 = vector.load %arg5[%c0_5, %c0_6] : memref<128x128xi8, #tpu.memory_space<vmem>>, vector<128x128xi8>
    %c0_i8 = arith.constant 0 : i8
    %14 = vector.broadcast %c0_i8 : i8 to vector<128x128xi8>
    %15 = arith.cmpi ne, %13, %14 : vector<128x128xi8>
    %cst_7 = arith.constant -2.000000e+30 : f32
    %16 = vector.broadcast %cst_7 : f32 to vector<128x128xf32>
    %17 = arith.select %15, %12, %16 : vector<128x128xi1>, vector<128x128xf32>
    %c0_8 = arith.constant 0 : index
    %c0_9 = arith.constant 0 : index
    %18 = vector.load %arg8[%c0_8, %c0_9] : memref<128x1xf32, #tpu.memory_space<vmem>>, vector<128x1xf32>
    %cst_10 = arith.constant dense<0xFF800000> : vector<128xf32>
    %19 = vector.multi_reduction <maximumf>, %17, %cst_10 [1] : vector<128x128xf32> to vector<128xf32>
    %20 = vector.shape_cast %19 : vector<128xf32> to vector<128x1xf32>
    %21 = arith.maximumf %18, %20 : vector<128x1xf32>
    %22 = arith.subf %18, %21 : vector<128x1xf32>
    %23 = math.exp %22 : vector<128x1xf32>
    %24 = vector.broadcast %21 : vector<128x1xf32> to vector<128x128xf32>
    %25 = arith.subf %17, %24 : vector<128x128xf32>
    %26 = math.exp %25 : vector<128x128xf32>
    %c0_11 = arith.constant 0 : index
    %c0_12 = arith.constant 0 : index
    %27 = vector.load %arg9[%c0_11, %c0_12] : memref<128x1xf32, #tpu.memory_space<vmem>>, vector<128x1xf32>
    %28 = arith.mulf %23, %27 : vector<128x1xf32>
    %cst_13 = arith.constant dense<0.000000e+00> : vector<128xf32>
    %29 = vector.multi_reduction <add>, %26, %cst_13 [1] : vector<128x128xf32> to vector<128xf32>
    %30 = vector.shape_cast %29 : vector<128xf32> to vector<128x1xf32>
    %31 = arith.addf %28, %30 : vector<128x1xf32>
    %c0_14 = arith.constant 0 : index
    %c0_15 = arith.constant 0 : index
    %32 = vector.load %arg9[%c0_14, %c0_15] : memref<128x1xf32, #tpu.memory_space<vmem>>, vector<128x1xf32>
    tpu.vector_store %arg9[%c0_14, %c0_15], %31 {strides = array<i32>} : memref<128x1xf32, #tpu.memory_space<vmem>>, vector<128x1xf32>,
    %c0_16 = arith.constant 0 : index
    %c0_17 = arith.constant 0 : index
    %33 = vector.load %arg10[%c0_16, %c0_17] : memref<128x128xf32, #tpu.memory_space<vmem>>, vector<128x128xf32>
    %34 = vector.broadcast %23 : vector<128x1xf32> to vector<128x128xf32>
    %35 = arith.mulf %34, %33 : vector<128x128xf32>
    %36 = arith.truncf %26 : vector<128x128xf32> to vector<128x128xbf16>
    %c0_18 = arith.constant 0 : index
    %c0_19 = arith.constant 0 : index
    %37 = vector.load %arg4[%c0_18, %c0_19] : memref<128x128xbf16, #tpu.memory_space<vmem>>, vector<128x128xbf16>
    %cst_20 = arith.constant dense<0.000000e+00> : vector<128x128xf32>
    %38 = tpu.matmul %36, %37, %cst_20 {dimension_numbers = #tpu.dot_dimension_numbers<[1], [0], [0], [1], [0, 0, 1, 1], [], []>} : vector<128x128xbf16>, vector<128x128xbf16>, vector<128x128xf32> -> vector<128x128xf32>
    %39 = arith.addf %35, %38 : vector<128x128xf32>
    %c0_21 = arith.constant 0 : index
    %c0_22 = arith.constant 0 : index
    %40 = vector.load %arg10[%c0_21, %c0_22] : memref<128x128xf32, #tpu.memory_space<vmem>>, vector<128x128xf32>
    tpu.vector_store %arg10[%c0_21, %c0_22], %39 {strides = array<i32>} : memref<128x128xf32, #tpu.memory_space<vmem>>, vector<128x128xf32>,
    %c0_23 = arith.constant 0 : index
    %c0_24 = arith.constant 0 : index
    %41 = vector.load %arg8[%c0_23, %c0_24] : memref<128x1xf32, #tpu.memory_space<vmem>>, vector<128x1xf32>
    tpu.vector_store %arg8[%c0_23, %c0_24], %21 {strides = array<i32>} : memref<128x1xf32, #tpu.memory_space<vmem>>, vector<128x1xf32>,
    %c0_i32_25 = arith.constant 0 : i32
    %42 = arith.cmpi eq, %arg1, %c0_i32_25 : i32
    %43 = arith.extui %42 : i1 to i32
    %c0_i32_26 = arith.constant 0 : i32
    %44 = arith.cmpi ne, %43, %c0_i32_26 : i32
    scf.if %44 {
      %c0_27 = arith.constant 0 : index
      %c0_28 = arith.constant 0 : index
      %45 = vector.load %arg9[%c0_27, %c0_28] : memref<128x1xf32, #tpu.memory_space<vmem>>, vector<128x1xf32>
      %46 = tpu.reciprocal %45 {approx = true} : vector<128x1xf32> -> vector<128x1xf32>
      %c0_29 = arith.constant 0 : index
      %c0_30 = arith.constant 0 : index
      %47 = vector.load %arg10[%c0_29, %c0_30] : memref<128x128xf32, #tpu.memory_space<vmem>>, vector<128x128xf32>
      %48 = vector.broadcast %46 : vector<128x1xf32> to vector<128x128xf32>
      %49 = arith.mulf %47, %48 : vector<128x128xf32>
      %c0_31 = arith.constant 0 : index
      %c0_32 = arith.constant 0 : index
      %50 = vector.load %arg6[%c0_31, %c0_32] : memref<1x128xf32, #tpu.memory_space<vmem>>, vector<1x128xf32>
      %51 = vector.broadcast %50 : vector<1x128xf32> to vector<128x128xf32>
      %52 = arith.addf %49, %51 : vector<128x128xf32>
      %cst_33 = arith.constant 0.000000e+00 : f32
      %53 = vector.broadcast %cst_33 : f32 to vector<128x128xf32>
      %54 = arith.maximumf %52, %53 : vector<128x128xf32>
      %55 = arith.truncf %54 : vector<128x128xf32> to vector<128x128xbf16>
      %c0_34 = arith.constant 0 : index
      %c0_35 = arith.constant 0 : index
      %56 = vector.load %arg7[%c0_34, %c0_35] : memref<128x128xbf16, #tpu.memory_space<vmem>>, vector<128x128xbf16>
      tpu.vector_store %arg7[%c0_34, %c0_35], %55 {strides = array<i32>} : memref<128x128xbf16, #tpu.memory_space<vmem>>, vector<128x128xbf16>,
    } else {
    }
    return
  }
  func.func @transform_0(%arg0: i32, %arg1: i32) -> (i32, i32) {
    %c0_i32 = arith.constant 0 : i32
    %c0_i32_0 = arith.constant 0 : i32
    return %arg0, %c0_i32 : i32, i32
  }
  func.func @transform_1(%arg0: i32, %arg1: i32) -> (i32, i32) {
    %c0_i32 = arith.constant 0 : i32
    %c0_i32_0 = arith.constant 0 : i32
    return %c0_i32, %arg1 : i32, i32
  }
  func.func @transform_2(%arg0: i32, %arg1: i32) -> (i32, i32) {
    %c0_i32 = arith.constant 0 : i32
    %c0_i32_0 = arith.constant 0 : i32
    return %arg1, %c0_i32 : i32, i32
  }
  func.func @transform_3(%arg0: i32, %arg1: i32) -> (i32, i32) {
    %c0_i32 = arith.constant 0 : i32
    return %arg0, %arg1 : i32, i32
  }
  func.func @transform_4(%arg0: i32, %arg1: i32) -> (i32, i32) {
    %c0_i32 = arith.constant 0 : i32
    %c0_i32_0 = arith.constant 0 : i32
    %c0_i32_1 = arith.constant 0 : i32
    return %c0_i32, %c0_i32_0 : i32, i32
  }
  func.func @transform_5(%arg0: i32, %arg1: i32) -> (i32, i32) {
    %c0_i32 = arith.constant 0 : i32
    %c0_i32_0 = arith.constant 0 : i32
    return %arg0, %c0_i32 : i32, i32
  }
}

</mosaic_0001>

<bundles_post_ra>
// kernel: gat_forward.4
= control target key start
LH: loop header
LB: loop body
LE: loop exit
PB: predicated region body
PF: predicated region fallthrough
CT: control target
= control target key end

     0   :  { %s462_s1 = inlined_call_operand.vmem [shape: bf16[128,128], index: 1, kind: input, shape index: {}]   ;;  %s463_s0 = inlined_call_operand.vmem [shape: bf16[128,128], index: 0, kind: input, shape index: {}]   ;;  %s464_s2 = inlined_call_operand.vmem [shape: bf16[128,128], index: 2, kind: output, shape index: {}]  }
   0x1   :  { %v303_v0 = vld [vmem:[%s462_s1 + $0x38] sm:$0xff]  ;;  %v302_v1 = vld [vmem:[%s462_s1 + $0x30] sm:$0xff]  ;;  %v301_v2 = vld [vmem:[%s462_s1 + $0x28] sm:$0xff] }
   0x2   :  { %139 = vmatpush.bf16.msra.mxu0 %v303_v0  ;;  %351 = vmatpush.bf16.msra.mxu1 %v303_v0  ;;  %v300_v3 = vld [vmem:[%s462_s1 + $0x20] sm:$0xff]  ;;  %v299_v4 = vld [vmem:[%s462_s1 + $0x18] sm:$0xff]  ;;  %v298_v5 = vld [vmem:[%s462_s1 + $0x10] sm:$0xff] }
   0x3   :  { %352 = vmatpush.bf16.msra.mxu2 %v303_v0  ;;  %353 = vmatpush.bf16.msra.mxu3 %v303_v0  ;;  %v297_v6 = vld [vmem:[%s462_s1 + $0x8] sm:$0xff]  ;;  %v296_v7 = vld [vmem:[%s462_s1] sm:$0xff]  ;;  %v290_v9 = vld [vmem:[%s463_s0 + $0x10] sm:$0xff] }
   0x4   :  { %v288_v8 = vld [vmem:[%s463_s0] sm:$0xff]  ;;  %v294_v11 = vld [vmem:[%s463_s0 + $0x30] sm:$0xff]  ;;  %v289_v12 = vld [vmem:[%s463_s0 + $0x8] sm:$0xff] }
   0x5   :  { %v292_v10 = vld [vmem:[%s463_s0 + $0x20] sm:$0xff]  ;;  %v291_v13 = vld [vmem:[%s463_s0 + $0x18] sm:$0xff]  ;;  %v293_v14 = vld [vmem:[%s463_s0 + $0x28] sm:$0xff] }
   0x6   :  { %140 = vmatpush.bf16.msra.mxu0 %v302_v1  ;;  %354 = vmatpush.bf16.msra.mxu1 %v302_v1  ;;  %v295_v15 = vld [vmem:[%s463_s0 + $0x38] sm:$0xff] }
   0x7   :  { %355 = vmatpush.bf16.msra.mxu2 %v302_v1  ;;  %356 = vmatpush.bf16.msra.mxu3 %v302_v1 }
   0xa   :  { %141 = vmatpush.bf16.msra.mxu0 %v301_v2  ;;  %357 = vmatpush.bf16.msra.mxu1 %v301_v2 }
   0xb   :  { %358 = vmatpush.bf16.msra.mxu2 %v301_v2  ;;  %359 = vmatpush.bf16.msra.mxu3 %v301_v2 }
   0xe   :  { %142 = vmatpush.bf16.msra.mxu0 %v300_v3  ;;  %360 = vmatpush.bf16.msra.mxu1 %v300_v3 }
   0xf   :  { %361 = vmatpush.bf16.msra.mxu2 %v300_v3  ;;  %362 = vmatpush.bf16.msra.mxu3 %v300_v3 }
  0x12   :  { %143 = vmatpush.bf16.msra.mxu0 %v299_v4  ;;  %363 = vmatpush.bf16.msra.mxu1 %v299_v4 }
  0x13   :  { %364 = vmatpush.bf16.msra.mxu2 %v299_v4  ;;  %365 = vmatpush.bf16.msra.mxu3 %v299_v4 }
  0x16   :  { %144 = vmatpush.bf16.msra.mxu0 %v298_v5  ;;  %366 = vmatpush.bf16.msra.mxu1 %v298_v5 }
  0x17   :  { %367 = vmatpush.bf16.msra.mxu2 %v298_v5  ;;  %368 = vmatpush.bf16.msra.mxu3 %v298_v5 }
  0x1a   :  { %145 = vmatpush.bf16.msra.mxu0 %v297_v6  ;;  %369 = vmatpush.bf16.msra.mxu1 %v297_v6 }
  0x1b   :  { %370 = vmatpush.bf16.msra.mxu2 %v297_v6  ;;  %371 = vmatpush.bf16.msra.mxu3 %v297_v6 }
  0x1e   :  { %146 = vmatpush.bf16.msra.mxu0 %v296_v7  ;;  %372 = vmatpush.bf16.msra.mxu1 %v296_v7 }
  0x1f   :  { %373 = vmatpush.bf16.msra.mxu2 %v296_v7  ;;  %374 = vmatpush.bf16.msra.mxu3 %v296_v7 }
  0x21   :  { %147 = vmatmul.bf16.vlgmr.msra.gmra.mxu0 %v288_v8  ;;  %157 = vmatmul.bf16.vlgmr.msra.gmra.mxu1 %v290_v9 }
  0x22   :  { %167 = vmatmul.bf16.vlgmr.msra.gmra.mxu2 %v292_v10  ;;  %177 = vmatmul.bf16.vlgmr.msra.gmra.mxu3 %v294_v11 }
  0x31   :  { %152 = vmatmul.bf16.gmra.mxu0 %v289_v12  ;;  %162 = vmatmul.bf16.gmra.mxu1 %v291_v13 }
  0x32   :  { %172 = vmatmul.bf16.gmra.mxu2 %v293_v14  ;;  %182 = vmatmul.bf16.gmra.mxu3 %v295_v15 }
  0x9e   :  { %v148_v16 = vpop.f32.mrf.mxu0  ;;  %v158_v17 = vpop.f32.mrf.mxu1 }
  0xa5   :  { %v168_v18 = vpop.f32.mrf.mxu2  ;;  %v178_v19 = vpop.f32.mrf.mxu3 }
  0xa6   :  { %v150_v20 = vpop.f32.mrf.mxu0  ;;  %v160_v21 = vpop.f32.mrf.mxu1 }
  0xa7   :  { %v307_v22 = vpack.c.bf16 %v150_v20, %v148_v16  ;;  %v317_v23 = vpack.c.bf16 %v160_v21, %v158_v17 }
  0xa9   :  { %308 = vst [vmem:[%s464_s2] sm:$0xff] %v307_v22  }
  0xaa   :  { %345 = vst [vmem:[%s464_s2 + $0x10] sm:$0xff] %v317_v23  }
  0xad   :  { %v170_v24 = vpop.f32.mrf.mxu2  ;;  %v180_v25 = vpop.f32.mrf.mxu3 }
  0xae   :  { %v327_v26 = vpack.c.bf16 %v170_v24, %v168_v18  ;;  %v337_v27 = vpack.c.bf16 %v180_v25, %v178_v19  ;;  %v153_v28 = vpop.f32.mrf.mxu0  ;;  %v163_v29 = vpop.f32.mrf.mxu1 }
  0xb0   :  { %347 = vst [vmem:[%s464_s2 + $0x20] sm:$0xff] %v327_v26  }
  0xb1   :  { %349 = vst [vmem:[%s464_s2 + $0x30] sm:$0xff] %v337_v27  }
  0xb5   :  { %v173_v30 = vpop.f32.mrf.mxu2  ;;  %v183_v31 = vpop.f32.mrf.mxu3 }
  0xb6   :  { %v155_v32 = vpop.f32.mrf.mxu0  ;;  %v165_v33 = vpop.f32.mrf.mxu1 }
  0xb7   :  { %v312_v34 = vpack.c.bf16 %v155_v32, %v153_v28  ;;  %v322_v35 = vpack.c.bf16 %v165_v33, %v163_v29 }
  0xb9   :  { %344 = vst [vmem:[%s464_s2 + $0x8] sm:$0xff] %v312_v34  }
  0xba   :  { %346 = vst [vmem:[%s464_s2 + $0x18] sm:$0xff] %v322_v35  }
  0xbd   :  { %v175_v36 = vpop.f32.mrf.mxu2  ;;  %v185_v37 = vpop.f32.mrf.mxu3 }
  0xbe   :  { %v332_v38 = vpack.c.bf16 %v175_v36, %v173_v30  ;;  %v342_v39 = vpack.c.bf16 %v185_v37, %v183_v31 }
  0xc0   :  { %348 = vst [vmem:[%s464_s2 + $0x28] sm:$0xff] %v332_v38  }
  0xc1   :  { %350 = vst [vmem:[%s464_s2 + $0x38] sm:$0xff] %v342_v39  }

// kernel: gat_forward.5
= control target key start
LH: loop header
LB: loop body
LE: loop exit
PB: predicated region body
PF: predicated region fallthrough
CT: control target
= control target key end

     0   :  { %v1387_v0 = vmov 0   ;;  %s2052_s0 = inlined_call_operand.vmem [shape: f32[128,1], index: 0, kind: input, shape index: {}]   ;;  %s2053_s1 = inlined_call_operand.vmem [shape: f32[1,128], index: 1, kind: input, shape index: {}]   ;;  %s2054_s3 = inlined_call_operand.vmem [shape: s8[128,128], index: 3, kind: input, shape index: {}]   ;;  %s2055_s2 = inlined_call_operand.vmem [shape: bf16[128,128], index: 2, kind: input, shape index: {}]   ;;  %s2056_s4 = inlined_call_operand.vmem [shape: f32[1,128], index: 4, kind: input, shape index: {}]   ;;  %s2057_s5 = inlined_call_operand.vmem [shape: bf16[128,128], index: 5, kind: output, shape index: {}]  }
   0x1   :  { %1287 = vset.pattern.permute.xlu1 %v1387_v0  ;;  %1286 = vset.pattern.permute.xlu0 %v1387_v0  ;;  %v77_v1 = vld [vmem:[%s2052_s0 + $0x10] sm:$0xff]  ;;  %v75_v2 = vld [vmem:[%s2052_s0] sm:$0xff]  ;;  %v78_v4 = vld [vmem:[%s2052_s0 + $0x18] sm:$0xff] }
   0x2   :  { %104 = vperm.xlu1 %1287, %v77_v1   ;;  %94 = vperm.xlu0 %1286, %v75_v2   ;;  %v79_v3 = vld [vmem:[%s2052_s0 + $0x20] sm:$0xff]  ;;  %v76_v5 = vld [vmem:[%s2052_s0 + $0x8] sm:$0xff]  ;;  %v82_v7 = vld [vmem:[%s2052_s0 + $0x38] sm:$0xff] }
   0x3   :  { %1288 = vset.pattern.permute.xlu2 %v1387_v0  ;;  %v80_v6 = vld [vmem:[%s2052_s0 + $0x28] sm:$0xff]  ;;  %v81_v8 = vld [vmem:[%s2052_s0 + $0x30] sm:$0xff]  ;;  %v83_v9 = vld [vmem:[%s2052_s0 + $0x40] sm:$0xff] }
   0x4   :  { %114 = vperm.xlu2 %1288, %v79_v3   ;;  %v85_v10 = vld [vmem:[%s2052_s0 + $0x50] sm:$0xff]  ;;  %v84_v11 = vld [vmem:[%s2052_s0 + $0x48] sm:$0xff]  ;;  %v86_v12 = vld [vmem:[%s2052_s0 + $0x58] sm:$0xff] }
   0x5   :  { %v88_v13 = vld [vmem:[%s2052_s0 + $0x68] sm:$0xff]  ;;  %v87_v14 = vld [vmem:[%s2052_s0 + $0x60] sm:$0xff]  ;;  %v89_v15 = vld [vmem:[%s2052_s0 + $0x70] sm:$0xff] }
   0x6   :  { %v90_v16 = vld [vmem:[%s2052_s0 + $0x78] sm:$0xff]  ;;  %v241_v17 = vld [vmem:[%s2054_s3 + $0x4] sm:$0x3]  ;;  %v239_v18 = vld [vmem:[%s2054_s3] sm:$0x3] }
   0x7   :  { %vm257_vm0 = vnez %v241_v17  ;;  %vm255_vm1 = vnez %v239_v18  ;;  %v243_v21 = vld [vmem:[%s2054_s3 + $0x8] sm:$0x3]  ;;  %v1485_v22 = vld [vmem:[%s2053_s1] ss:$0 sm:$0xff]  ;;  %v240_v25 = vld [vmem:[%s2054_s3 + $0x2] sm:$0x3] }
   0x8   :  { %v273_v19 = vsel %vm257_vm0, 16843009, %v1387_v0  ;;  %v271_v20 = vsel %vm255_vm1, 16843009, %v1387_v0  ;;  %vm259_vm2 = vnez %v243_v21  ;;  %vm256_vm3 = vnez %v240_v25  ;;  %v242_v33 = vld [vmem:[%s2054_s3 + $0x6] sm:$0x3] }
   0x9   :  { %v289_v23 = vunpack.c.0.s8 %v273_v19  ;;  %v287_v24 = vunpack.c.0.s8 %v271_v20  ;;  %v275_v32 = vsel %vm259_vm2, 16843009, %v1387_v0  ;;  %v272_v36 = vsel %vm256_vm3, 16843009, %v1387_v0  ;;  %v246_v37 = vld [vmem:[%s2054_s3 + $0xe] sm:$0x3] }
   0xa   :  { %109 = vperm.xlu1 %1287, %v78_v4   ;;  %99 = vperm.xlu0 %1286, %v76_v5   ;;  %v245_v38 = vld [vmem:[%s2054_s3 + $0xc] sm:$0x3]  ;;  %v291_v42 = vunpack.c.0.s8 %v275_v32  ;;  %vm258_vm9 = vnez %v242_v33  ;;  %v288_v45 = vunpack.c.0.s8 %v272_v36  ;;  %vm262_vm10 = vnez %v246_v37  ;;  %v244_v56 = vld [vmem:[%s2054_s3 + $0xa] sm:$0x3]  ;;  %v249_v59 = vld [vmem:[%s2054_s3 + $0x14] sm:$0x3] }
   0xb   :  { %vm305_vm4 = vcmp.ne.s32.totalorder %v289_v23, 0  ;;  %vm303_vm5 = vcmp.ne.s32.totalorder %v287_v24, 0  ;;  %vm261_vm11 = vnez %v245_v38  ;;  %v274_v50 = vsel %vm258_vm9, 16843009, %v1387_v0  ;;  %v248_v60 = vld [vmem:[%s2054_s3 + $0x12] sm:$0x3] }
   0xc   :  { %119 = vperm.xlu2 %1288, %v80_v6   ;;  %vm307_vm12 = vcmp.ne.s32.totalorder %v291_v42, 0  ;;  %v278_v53 = vsel %vm262_vm10, 16843009, %v1387_v0  ;;  %v277_v54 = vsel %vm261_vm11, 16843009, %v1387_v0  ;;  %vm304_vm14 = vcmp.ne.s32.totalorder %v288_v45, 0 }
   0xd   :  { %v290_v58 = vunpack.c.0.s8 %v274_v50  ;;  %v294_v62 = vunpack.c.0.s8 %v278_v53  ;;  %v293_v2 = vunpack.c.0.s8 %v277_v54  ;;  %vm260_vm15 = vnez %v244_v56  ;;  %v252_v21 = vld [vmem:[%s2054_s3 + $0x1a] sm:$0x3]  ;;  %v251_v23 = vld [vmem:[%s2054_s3 + $0x18] sm:$0x3]  ;;  %v254_v54 = vld [vmem:[%s2054_s3 + $0x1e] sm:$0x3] }
   0xe   :  { %vm265_vm1 = vnez %v249_v59  ;;  %vm264_vm2 = vnez %v248_v60  ;;  %vm268_vm10 = vnez %v252_v21  ;;  %vm267_vm11 = vnez %v251_v23 }
   0xf   :  { %vm1531_vm3 = vcmp.ne.s32.totalorder %v290_v58, 0  ;;  %v1388_v36 = vmov -1e+30   ;;  %v284_v45 = vsel %vm268_vm10, 16843009, %v1387_v0 }
  0x10   :  { %v300_v59 = vunpack.c.0.s8 %v284_v45 }
  0x12   :  { %129 = vperm.xlu1 %1287, %v82_v7   ;;  %124 = vperm.xlu0 %1286, %v81_v8  }
  0x14   :  { %134 = vperm.xlu2 %1288, %v83_v9  }
  0x1a   :  { %144 = vperm.xlu1 %1287, %v85_v10   ;;  %139 = vperm.xlu0 %1286, %v84_v11   ;;  %v276_v10 = vsel %vm260_vm15, 16843009, %v1387_v0  ;;  %v247_v11 = vld [vmem:[%s2054_s3 + $0x10] sm:$0x3] }
  0x1b   :  { %v292_v20 = vunpack.c.0.s8 %v276_v10  ;;  %v253_v10 = vld [vmem:[%s2054_s3 + $0x1c] sm:$0x3] }
  0x1c   :  { %149 = vperm.xlu2 %1288, %v86_v12  }
  0x22   :  { %159 = vperm.xlu1 %1287, %v88_v13   ;;  %154 = vperm.xlu0 %1286, %v87_v14   ;;  %v281_v14 = vsel %vm265_vm1, 16843009, %v1387_v0 }
  0x24   :  { %164 = vperm.xlu2 %1288, %v89_v15   ;;  %v280_v15 = vsel %vm264_vm2, 16843009, %v1387_v0 }
  0x2a   :  { %169 = vperm.xlu0 %1286, %v90_v16  }
  0x5e   :  { %v115_v26 = vpop.permute.xlu2 %114 }
  0x5f   :  { %v179_v29 = vadd.f32 %v1485_v22, %v115_v26  ;;  %v297_v26 = vunpack.c.0.s8 %v281_v14 }
  0x61   :  { %v211_v39 = vmul.f32 0.2, %v179_v29  ;;  %vm195_vm8 = vcmp.gt.f32.partialorder %v179_v29, 0.0 }
  0x63   :  { %v227_v49 = vsel %vm195_vm8, %v179_v29, %v211_v39  ;;  %vm263_vm8 = vnez %v247_v11 }
  0x64   :  { %v1518_v57 = vsel %vm307_vm12, %v227_v49, -2e+30  ;;  %vm26_vm12 = vcmask 7168  }
  0x65   :  { %27 = vst.msk [vmem:[#allocation2] sm:$0xff] %vm26_vm12, %v1388_v36 }
  0x66   :  { %v120_v51 = vpop.permute.xlu2 %119  ;;  %28 = vst.msk [vmem:[#allocation2 + $0x8] sm:$0xff] %vm26_vm12, %v1388_v36 }
  0x67   :  { %v180_v3 = vadd.f32 %v1485_v22, %v120_v51  ;;  %29 = vst.msk [vmem:[#allocation2 + $0x10] sm:$0xff] %vm26_vm12, %v1388_v36 }
  0x68   :  { %30 = vst.msk [vmem:[#allocation2 + $0x18] sm:$0xff] %vm26_vm12, %v1388_v36 }
  0x69   :  { %v212_v18 = vmul.f32 0.2, %v180_v3  ;;  %vm196_vm9 = vcmp.gt.f32.partialorder %v180_v3, 0.0  ;;  %31 = vst.msk [vmem:[#allocation2 + $0x20] sm:$0xff] %vm26_vm12, %v1388_v36 }
  0x6a   :  { %32 = vst.msk [vmem:[#allocation2 + $0x28] sm:$0xff] %vm26_vm12, %v1388_v36 }
  0x6b   :  { %v228_v33 = vsel %vm196_vm9, %v180_v3, %v212_v18  ;;  %33 = vst.msk [vmem:[#allocation2 + $0x30] sm:$0xff] %vm26_vm12, %v1388_v36 }
  0x6c   :  { %34 = vst.msk [vmem:[#allocation2 + $0x38] sm:$0xff] %vm26_vm12, %v1388_v36 }
  0x6d   :  { %35 = vst.msk [vmem:[#allocation2 + $0x40] sm:$0xff] %vm26_vm12, %v1388_v36  ;;  %v1707_v45 = vld [vmem:[#allocation2 + $0x8] sm:$0xff] }
  0x6e   :  { %v135_v19 = vpop.permute.xlu2 %134  ;;  %36 = vst.msk [vmem:[#allocation2 + $0x48] sm:$0xff] %vm26_vm12, %v1388_v36 }
  0x6f   :  { %v183_v37 = vadd.f32 %v1485_v22, %v135_v19  ;;  %37 = vst.msk [vmem:[#allocation2 + $0x50] sm:$0xff] %vm26_vm12, %v1388_v36 }
  0x70   :  { %38 = vst.msk [vmem:[#allocation2 + $0x58] sm:$0xff] %vm26_vm12, %v1388_v36  ;;  %v339_v42 = vld [vmem:[#allocation2 + $0x20] sm:$0xff] }
  0x71   :  { %v215_v50 = vmul.f32 0.2, %v183_v37  ;;  %39 = vst.msk [vmem:[#allocation2 + $0x60] sm:$0xff] %vm26_vm12, %v1388_v36 }
  0x72   :  { %40 = vst.msk [vmem:[#allocation2 + $0x68] sm:$0xff] %vm26_vm12, %v1388_v36 }
  0x73   :  { %41 = vst.msk [vmem:[#allocation2 + $0x70] sm:$0xff] %vm26_vm12, %v1388_v36 }
  0x74   :  { %v105_v27 = vpop.permute.xlu1 %104  ;;  %v95_v28 = vpop.permute.xlu0 %94  ;;  %42 = vst.msk [vmem:[#allocation2 + $0x78] sm:$0xff] %vm26_vm12, %v1388_v36  ;;  %v1389_v36 = vmov 0.0  }
  0x75   :  { %v177_v30 = vadd.f32 %v1485_v22, %v105_v27  ;;  %v175_v31 = vadd.f32 %v1485_v22, %v95_v28  ;;  %43 = vst.msk [vmem:[#allocation3] sm:$0xff] %vm26_vm12, %v1389_v36 }
  0x76   :  { %44 = vst.msk [vmem:[#allocation3 + $0x8] sm:$0xff] %vm26_vm12, %v1389_v36 }
  0x77   :  { %v209_v34 = vmul.f32 0.2, %v177_v30  ;;  %v207_v35 = vmul.f32 0.2, %v175_v31  ;;  %vm193_vm6 = vcmp.gt.f32.partialorder %v177_v30, 0.0  ;;  %vm191_vm7 = vcmp.gt.f32.partialorder %v175_v31, 0.0 }
  0x78   :  { %45 = vst.msk [vmem:[#allocation3 + $0x10] sm:$0xff] %vm26_vm12, %v1389_v36 }
  0x79   :  { %v225_v40 = vsel %vm193_vm6, %v177_v30, %v209_v34  ;;  %v223_v41 = vsel %vm191_vm7, %v175_v31, %v207_v35  ;;  %v296_v30 = vunpack.c.0.s8 %v280_v15  ;;  %v279_v35 = vsel %vm263_vm8, 16843009, %v1387_v0  ;;  %46 = vst.msk [vmem:[#allocation3 + $0x18] sm:$0xff] %vm26_vm12, %v1389_v36 }
  0x7a   :  { %v1504_v43 = vsel %vm305_vm4, %v225_v40, -2e+30  ;;  %v1506_v44 = vsel %vm303_vm5, %v223_v41, -2e+30  ;;  %vm1537_vm4 = vcmp.ne.s32.totalorder %v294_v62, 0  ;;  %vm1545_vm5 = vcmp.ne.s32.totalorder %v293_v2, 0 }
  0x7b   :  { %355 = vmax.xlane.f32.xlu0 %v1504_v43  ;;  %351 = vmax.xlane.f32.xlu1 %v1506_v44  ;;  %v250_v41 = vld [vmem:[%s2054_s3 + $0x16] sm:$0x3]  ;;  %vm1592_vm15 = vcmp.ne.s32.totalorder %v296_v30, 0  ;;  %v295_v53 = vunpack.c.0.s8 %v279_v35  ;;  %47 = vst.msk [vmem:[#allocation3 + $0x20] sm:$0xff] %vm26_vm12, %v1389_v36 }
  0x7c   :  { %v110_v46 = vpop.permute.xlu1 %109  ;;  %v100_v47 = vpop.permute.xlu0 %99  ;;  %vm266_vm2 = vnez %v250_v41  ;;  %48 = vst.msk [vmem:[#allocation3 + $0x28] sm:$0xff] %vm26_vm12, %v1389_v36 }
  0x7d   :  { %v176_v48 = vadd.f32 %v1485_v22, %v100_v47  ;;  %v178_v52 = vadd.f32 %v1485_v22, %v110_v46  ;;  %v283_v46 = vsel %vm267_vm11, 16843009, %v1387_v0  ;;  %vm269_vm11 = vnez %v253_v10  ;;  %49 = vst.msk [vmem:[#allocation3 + $0x30] sm:$0xff] %vm26_vm12, %v1389_v36 }
  0x7e   :  { %v299_v60 = vunpack.c.0.s8 %v283_v46  ;;  %50 = vst.msk [vmem:[#allocation3 + $0x38] sm:$0xff] %vm26_vm12, %v1389_v36 }
  0x7f   :  { %v208_v55 = vmul.f32 0.2, %v176_v48  ;;  %vm192_vm13 = vcmp.gt.f32.partialorder %v176_v48, 0.0  ;;  %v210_v63 = vmul.f32 0.2, %v178_v52  ;;  %vm194_vm0 = vcmp.gt.f32.partialorder %v178_v52, 0.0 }
  0x80   :  { %51 = vst.msk [vmem:[#allocation3 + $0x40] sm:$0xff] %vm26_vm12, %v1389_v36 }
  0x81   :  { %v224_v61 = vsel %vm192_vm13, %v176_v48, %v208_v55  ;;  %v226_v12 = vsel %vm194_vm0, %v178_v52, %v210_v63  ;;  %vm1572_vm13 = vcmp.ne.s32.totalorder %v292_v20, 0  ;;  %v150_v55 = vpop.permute.xlu2 %149  ;;  %v282_v63 = vsel %vm266_vm2, 16843009, %v1387_v0  ;;  %52 = vst.msk [vmem:[#allocation3 + $0x48] sm:$0xff] %vm26_vm12, %v1389_v36 }
  0x82   :  { %v1526_v1 = vsel %vm304_vm14, %v224_v61, -2e+30  ;;  %v1563_v28 = vsel %vm1531_vm3, %v226_v12, -2e+30  ;;  %vm1583_vm14 = vcmp.ne.s32.totalorder %v297_v26, 0  ;;  %vm199_vm3 = vcmp.gt.f32.partialorder %v183_v37, 0.0 }
  0x83   :  { %359 = vmax.xlane.f32.xlu1 %v1518_v57  ;;  %353 = vmax.xlane.f32.xlu2 %v1526_v1  ;;  %v1604_v49 = vsel %vm1572_vm13, %v228_v33, -2e+30  ;;  %v186_v2 = vadd.f32 %v1485_v22, %v150_v55  ;;  %v231_v6 = vsel %vm199_vm3, %v183_v37, %v215_v50  ;;  %v285_v26 = vsel %vm269_vm11, 16843009, %v1387_v0  ;;  %53 = vst.msk [vmem:[#allocation3 + $0x50] sm:$0xff] %vm26_vm12, %v1389_v36  ;;  %v337_v37 = vld [vmem:[#allocation2 + $0x10] sm:$0xff] }
  0x84   :  { %v130_v4 = vpop.permute.xlu1 %129  ;;  %v125_v5 = vpop.permute.xlu0 %124  ;;  %v301_v34 = vunpack.c.0.s8 %v285_v26  ;;  %54 = vst.msk [vmem:[#allocation3 + $0x58] sm:$0xff] %vm26_vm12, %v1389_v36  ;;  %v1779_v26 = vld [vmem:[#allocation2 + $0x58] sm:$0xff] }
  0x85   :  { %v182_v7 = vadd.f32 %v1485_v22, %v130_v4  ;;  %v181_v8 = vadd.f32 %v1485_v22, %v125_v5  ;;  %v218_v11 = vmul.f32 0.2, %v186_v2  ;;  %vm202_vm10 = vcmp.gt.f32.partialorder %v186_v2, 0.0  ;;  %55 = vst.msk [vmem:[#allocation3 + $0x60] sm:$0xff] %vm26_vm12, %v1389_v36 }
  0x86   :  { %56 = vst.msk [vmem:[#allocation3 + $0x68] sm:$0xff] %vm26_vm12, %v1389_v36 }
  0x87   :  { %v214_v16 = vmul.f32 0.2, %v182_v7  ;;  %v213_v17 = vmul.f32 0.2, %v181_v8  ;;  %vm198_vm6 = vcmp.gt.f32.partialorder %v182_v7, 0.0  ;;  %vm197_vm7 = vcmp.gt.f32.partialorder %v181_v8, 0.0 }
  0x88   :  { %v234_v23 = vsel %vm202_vm10, %v186_v2, %v218_v11  ;;  %57 = vst.msk [vmem:[#allocation3 + $0x70] sm:$0xff] %vm26_vm12, %v1389_v36  ;;  %v1737_v2 = vld [vmem:[#allocation2 + $0x28] sm:$0xff] }
  0x89   :  { %v230_v24 = vsel %vm198_vm6, %v182_v7, %v214_v16  ;;  %v229_v25 = vsel %vm197_vm7, %v181_v8, %v213_v17  ;;  %vm311_vm6 = vcmp.ne.s32.totalorder %v295_v53, 0  ;;  %vm315_vm7 = vcmp.ne.s32.totalorder %v299_v60, 0  ;;  %v165_v19 = vpop.permute.xlu2 %164  ;;  %58 = vst.msk [vmem:[#allocation3 + $0x78] sm:$0xff] %vm26_vm12, %v1389_v36  ;;  %v1720_v53 = vld [vmem:[#allocation2 + $0x30] sm:$0xff]  ;;  %v1759_v11 = vld [vmem:[#allocation2 + $0x68] sm:$0xff] }
  0x8a   :  { %v1559_v27 = vsel %vm1537_vm4, %v230_v24, -2e+30  ;;  %v1567_v29 = vsel %vm1545_vm5, %v229_v25, -2e+30  ;;  %vm270_vm4 = vnez %v254_v54  ;;  %vm1637_vm5 = vcmp.ne.s32.totalorder %v300_v59, 0 }
  0x8b   :  { %365 = vmax.xlane.f32.xlu1 %v1559_v27  ;;  %357 = vmax.xlane.f32.xlu2 %v1563_v28  ;;  %v286_v9 = vsel %vm270_vm4, 16843009, %v1387_v0  ;;  %v1649_v13 = vsel %vm311_vm6, %v231_v6, -2e+30  ;;  %v298_v17 = vunpack.c.0.s8 %v282_v63  ;;  %v189_v24 = vadd.f32 %v1485_v22, %v165_v19  ;;  %v1698_v0 = vld [vmem:[#allocation2] sm:$0xff]  ;;  %v1735_v63 = vld [vmem:[#allocation2 + $0x50] sm:$0xff] }
  0x8c   :  { %363 = vmax.xlane.f32.xlu0 %v1567_v29  ;;  %v145_v31 = vpop.permute.xlu1 %144  ;;  %v140_v32 = vpop.permute.xlu0 %139  ;;  %v302_v18 = vunpack.c.0.s8 %v286_v9 }
  0x8d   :  { %v185_v38 = vadd.f32 %v1485_v22, %v145_v31  ;;  %v184_v39 = vadd.f32 %v1485_v22, %v140_v32  ;;  %vm314_vm13 = vcmp.ne.s32.totalorder %v298_v17, 0  ;;  %v221_v33 = vmul.f32 0.2, %v189_v24 }
  0x8e   :  { %v1673_v31 = vsel %vm314_vm13, %v234_v23, -2e+30 }
  0x8f   :  { %v217_v47 = vmul.f32 0.2, %v185_v38  ;;  %v216_v48 = vmul.f32 0.2, %v184_v39  ;;  %vm201_vm0 = vcmp.gt.f32.partialorder %v185_v38, 0.0  ;;  %vm200_vm1 = vcmp.gt.f32.partialorder %v184_v39, 0.0 }
  0x91   :  { %v233_v51 = vsel %vm201_vm0, %v185_v38, %v217_v47  ;;  %v232_v52 = vsel %vm200_vm1, %v184_v39, %v216_v48  ;;  %vm205_vm0 = vcmp.gt.f32.partialorder %v189_v24, 0.0  ;;  %vm317_vm1 = vcmp.ne.s32.totalorder %v301_v34, 0 }
  0x92   :  { %v1615_v56 = vsel %vm1583_vm14, %v233_v51, -2e+30  ;;  %v1619_v58 = vsel %vm1592_vm15, %v232_v52, -2e+30  ;;  %vm318_vm15 = vcmp.ne.s32.totalorder %v302_v18, 0  ;;  %v237_v35 = vsel %vm205_vm0, %v189_v24, %v221_v33  ;;  %v1716_v51 = vld [vmem:[#allocation2 + $0x38] sm:$0xff] }
  0x93   :  { %371 = vmax.xlane.f32.xlu1 %v1615_v56  ;;  %361 = vmax.xlane.f32.xlu2 %v1604_v49  ;;  %v1718_v52 = vld [vmem:[#allocation2 + $0x18] sm:$0xff] }
  0x94   :  { %369 = vmax.xlane.f32.xlu0 %v1619_v58  ;;  %v160_v61 = vpop.permute.xlu1 %159  ;;  %v155_v62 = vpop.permute.xlu0 %154 }
  0x95   :  { %v188_v3 = vadd.f32 %v1485_v22, %v160_v61  ;;  %v187_v4 = vadd.f32 %v1485_v22, %v155_v62 }
  0x97   :  { %v220_v7 = vmul.f32 0.2, %v188_v3  ;;  %v219_v8 = vmul.f32 0.2, %v187_v4  ;;  %vm204_vm8 = vcmp.gt.f32.partialorder %v188_v3, 0.0  ;;  %vm203_vm9 = vcmp.gt.f32.partialorder %v187_v4, 0.0 }
  0x99   :  { %v236_v12 = vsel %vm204_vm8, %v188_v3, %v220_v7  ;;  %v235_v14 = vsel %vm203_vm9, %v187_v4, %v219_v8  ;;  %v1739_v3 = vld [vmem:[#allocation2 + $0x48] sm:$0xff] }
  0x9a   :  { %v1655_v15 = vsel %vm1637_vm5, %v236_v12, -2e+30  ;;  %v1657_v16 = vsel %vm315_vm7, %v235_v14, -2e+30  ;;  %v1761_v12 = vld [vmem:[#allocation2 + $0x40] sm:$0xff] }
  0x9b   :  { %377 = vmax.xlane.f32.xlu1 %v1655_v15  ;;  %367 = vmax.xlane.f32.xlu2 %v1649_v13  ;;  %v1763_v14 = vld [vmem:[#allocation2 + $0x60] sm:$0xff] }
  0x9c   :  { %375 = vmax.xlane.f32.xlu0 %v1657_v16  ;;  %v170_v20 = vpop.permute.xlu0 %169 }
  0x9d   :  { %v190_v21 = vadd.f32 %v1485_v22, %v170_v20  ;;  %v1679_v22 = vsel %vm317_vm1, %v237_v35, -2e+30 }
  0x9f   :  { %v222_v25 = vmul.f32 0.2, %v190_v21  ;;  %vm206_vm14 = vcmp.gt.f32.partialorder %v190_v21, 0.0 }
  0xa1   :  { %v238_v30 = vsel %vm206_vm14, %v190_v21, %v222_v25 }
  0xa2   :  { %v1675_v32 = vsel %vm318_vm15, %v238_v30, -2e+30  ;;  %v1781_v30 = vld [vmem:[#allocation2 + $0x78] sm:$0xff] }
  0xa3   :  { %373 = vmax.xlane.f32.xlu2 %v1673_v31 }
  0xa4   :  { %381 = vmax.xlane.f32.xlu0 %v1675_v32 }
  0xab   :  { %379 = vmax.xlane.f32.xlu2 %v1679_v22 }
  0xee   :  { %v352_v38 = vpop.xlane.xlu1 %351  ;;  %v356_v39 = vpop.xlane.xlu0 %355 }
  0xef   :  { %v1701_v40 = vmax.f32 %v1698_v0, %v352_v38  ;;  %v385_v41 = vmax.f32 %v337_v37, %v356_v39 }
  0xf1   :  { %937 = vst.msk [vmem:[#allocation2] sm:$0xff] %vm26_vm12, %v1701_v40  ;;  %449 = vperm.xlu1 %1287, %v1701_v40   ;;  %459 = vperm.xlu0 %1286, %v385_v41   ;;  %v401_v10 = vsub.f32 %v337_v37, %v385_v41  ;;  %v399_v39 = vsub.f32 %v1698_v0, %v1701_v40 }
  0xf2   :  { %939 = vst.msk [vmem:[#allocation2 + $0x10] sm:$0xff] %vm26_vm12, %v385_v41 }
  0xf3   :  { %v419_v17 = vmul.f32 1.442695, %v401_v10  ;;  %v415_v0 = vmul.f32 1.442695, %v399_v39 }
  0xf5   :  { %1291 = vpow2.f32 %v419_v17 }
  0xf6   :  { %v360_v46 = vpop.xlane.xlu1 %359  ;;  %v354_v47 = vpop.xlane.xlu2 %353 }
  0xf7   :  { %v387_v48 = vmax.f32 %v339_v42, %v360_v46  ;;  %v1710_v50 = vmax.f32 %v1707_v45, %v354_v47  ;;  %v1803_v46 = vld [vmem:[#allocation2 + $0x70] sm:$0xff] }
  0xf9   :  { %941 = vst.msk [vmem:[#allocation2 + $0x20] sm:$0xff] %vm26_vm12, %v387_v48  ;;  %454 = vperm.xlu2 %1288, %v1710_v50   ;;  %469 = vperm.xlu0 %1286, %v387_v48   ;;  %v403_v25 = vsub.f32 %v339_v42, %v387_v48  ;;  %v400_v42 = vsub.f32 %v1707_v45, %v1710_v50 }
  0xfa   :  { %938 = vst.msk [vmem:[#allocation2 + $0x8] sm:$0xff] %vm26_vm12, %v1710_v50 }
  0xfb   :  { %v423_v33 = vmul.f32 1.442695, %v403_v25  ;;  %v1786_v37 = vpop.eup %1291  ;;  %v417_v48 = vmul.f32 1.442695, %v400_v42 }
  0xfd   :  { %1293 = vpow2.f32 %v423_v33 }
  0xfe   :  { %v366_v54 = vpop.xlane.xlu1 %365  ;;  %v358_v55 = vpop.xlane.xlu2 %357  ;;  %1295 = vpow2.f32 %v415_v0 }
  0xff   :  { %v390_v59 = vmax.f32 %v1716_v51, %v366_v54  ;;  %v1724_v60 = vmax.f32 %v1718_v52, %v358_v55  ;;  %v364_v61 = vpop.xlane.xlu0 %363 }
 0x100   :  { %v1727_v62 = vmax.f32 %v1720_v53, %v364_v61 }
 0x101   :  { %944 = vst.msk [vmem:[#allocation2 + $0x38] sm:$0xff] %vm26_vm12, %v390_v59  ;;  %464 = vperm.xlu1 %1287, %v1724_v60   ;;  %484 = vperm.xlu0 %1286, %v390_v59   ;;  %v406_v41 = vsub.f32 %v1716_v51, %v390_v59  ;;  %v402_v51 = vsub.f32 %v1718_v52, %v1724_v60 }
 0x102   :  { %940 = vst.msk [vmem:[#allocation2 + $0x18] sm:$0xff] %vm26_vm12, %v1724_v60 }
 0x103   :  { %943 = vst.msk [vmem:[#allocation2 + $0x30] sm:$0xff] %vm26_vm12, %v1727_v62  ;;  %v429_v40 = vmul.f32 1.442695, %v406_v41  ;;  %v1808_v55 = vpop.eup %1293  ;;  %v421_v59 = vmul.f32 1.442695, %v402_v51 }
 0x104   :  { %v1821_v52 = vpop.eup %1295 }
 0x105   :  { %1297 = vpow2.f32 %v429_v40 }
 0x106   :  { %v372_v4 = vpop.xlane.xlu1 %371  ;;  %v362_v5 = vpop.xlane.xlu2 %361  ;;  %1299 = vpow2.f32 %v417_v48 }
 0x107   :  { %v1742_v6 = vmax.f32 %v1735_v63, %v372_v4  ;;  %v1745_v7 = vmax.f32 %v1737_v2, %v362_v5  ;;  %v370_v8 = vpop.xlane.xlu0 %369  ;;  %1301 = vpow2.f32 %v421_v59 }
 0x108   :  { %v1748_v9 = vmax.f32 %v1739_v3, %v370_v8  ;;  %v405_v8 = vsub.f32 %v1720_v53, %v1727_v62 }
 0x109   :  { %947 = vst.msk [vmem:[#allocation2 + $0x50] sm:$0xff] %vm26_vm12, %v1742_v6  ;;  %474 = vperm.xlu2 %1288, %v1745_v7   ;;  %499 = vperm.xlu0 %1286, %v1742_v6   ;;  %v409_v45 = vsub.f32 %v1735_v63, %v1742_v6  ;;  %v404_v50 = vsub.f32 %v1737_v2, %v1745_v7 }
 0x10a   :  { %942 = vst.msk [vmem:[#allocation2 + $0x28] sm:$0xff] %vm26_vm12, %v1745_v7  ;;  %479 = vperm.xlu1 %1287, %v1727_v62   ;;  %v427_v6 = vmul.f32 1.442695, %v405_v8  ;;  %v1211_v62 = vld [vmem:[%s2055_s2 + $0x38] sm:$0xff] }
 0x10b   :  { %946 = vst.msk [vmem:[#allocation2 + $0x48] sm:$0xff] %vm26_vm12, %v1748_v9  ;;  %v435_v61 = vmul.f32 1.442695, %v409_v45  ;;  %v425_v60 = vmul.f32 1.442695, %v404_v50  ;;  %v1823_v4 = vpop.eup %1297  ;;  %856 = vmatpush.bf16.msra.mxu0 %v1211_v62  ;;  %1259 = vmatpush.bf16.msra.mxu1 %v1211_v62 }
 0x10c   :  { %v1825_v5 = vpop.eup %1299  ;;  %1260 = vmatpush.bf16.msra.mxu2 %v1211_v62  ;;  %1261 = vmatpush.bf16.msra.mxu3 %v1211_v62 }
 0x10d   :  { %1303 = vpow2.f32 %v435_v61  ;;  %v1835_v10 = vpop.eup %1301 }
 0x10e   :  { %v378_v18 = vpop.xlane.xlu1 %377  ;;  %v368_v19 = vpop.xlane.xlu2 %367  ;;  %1305 = vpow2.f32 %v425_v60 }
 0x10f   :  { %v396_v20 = vmax.f32 %v1759_v11, %v378_v18  ;;  %v1767_v21 = vmax.f32 %v1761_v12, %v368_v19  ;;  %v376_v23 = vpop.xlane.xlu0 %375  ;;  %1307 = vpow2.f32 %v427_v6 }
 0x110   :  { %v1770_v24 = vmax.f32 %v1763_v14, %v376_v23 }
 0x111   :  { %950 = vst.msk [vmem:[#allocation2 + $0x68] sm:$0xff] %vm26_vm12, %v396_v20  ;;  %489 = vperm.xlu2 %1288, %v1767_v21   ;;  %514 = vperm.xlu0 %1286, %v396_v20   ;;  %v412_v63 = vsub.f32 %v1759_v11, %v396_v20  ;;  %v407_v2 = vsub.f32 %v1761_v12, %v1767_v21  ;;  %v1210_v20 = vld [vmem:[%s2055_s2 + $0x30] sm:$0xff] }
 0x112   :  { %945 = vst.msk [vmem:[#allocation2 + $0x40] sm:$0xff] %vm26_vm12, %v1767_v21  ;;  %494 = vperm.xlu1 %1287, %v1748_v9   ;;  %v408_v11 = vsub.f32 %v1739_v3, %v1748_v9  ;;  %857 = vmatpush.bf16.msra.mxu0 %v1210_v20  ;;  %v1209_v9 = vld [vmem:[%s2055_s2 + $0x28] sm:$0xff] }
 0x113   :  { %949 = vst.msk [vmem:[#allocation2 + $0x60] sm:$0xff] %vm26_vm12, %v1770_v24  ;;  %v441_v7 = vmul.f32 1.442695, %v412_v63  ;;  %v431_v17 = vmul.f32 1.442695, %v407_v2  ;;  %v1837_v18 = vpop.eup %1303  ;;  %1262 = vmatpush.bf16.msra.mxu1 %v1210_v20  ;;  %1263 = vmatpush.bf16.msra.mxu2 %v1210_v20 }
 0x114   :  { %v1839_v53 = vpop.eup %1305  ;;  %v433_v19 = vmul.f32 1.442695, %v408_v11  ;;  %1264 = vmatpush.bf16.msra.mxu3 %v1210_v20 }
 0x115   :  { %1309 = vpow2.f32 %v441_v7  ;;  %v1854_v21 = vpop.eup %1307 }
 0x116   :  { %v374_v34 = vpop.xlane.xlu2 %373  ;;  %1311 = vpow2.f32 %v431_v17  ;;  %858 = vmatpush.bf16.msra.mxu0 %v1209_v9 }
 0x117   :  { %v1784_v35 = vmax.f32 %v1779_v26, %v374_v34  ;;  %v382_v36 = vpop.xlane.xlu0 %381  ;;  %1313 = vpow2.f32 %v433_v19  ;;  %v1208_v34 = vld [vmem:[%s2055_s2 + $0x20] sm:$0xff]  ;;  %1265 = vmatpush.bf16.msra.mxu1 %v1209_v9  ;;  %1266 = vmatpush.bf16.msra.mxu2 %v1209_v9 }
 0x118   :  { %v1789_v38 = vmax.f32 %v1781_v30, %v382_v36  ;;  %1267 = vmatpush.bf16.msra.mxu3 %v1209_v9 }
 0x119   :  { %948 = vst.msk [vmem:[#allocation2 + $0x58] sm:$0xff] %vm26_vm12, %v1784_v35  ;;  %504 = vperm.xlu2 %1288, %v1784_v35   ;;  %700 = vperm.xlu0 %1286, %v1786_v37   ;;  %v410_v12 = vsub.f32 %v1779_v26, %v1784_v35  ;;  %v411_v26 = vsub.f32 %v1763_v14, %v1770_v24  ;;  %v1207_v14 = vld [vmem:[%s2055_s2 + $0x18] sm:$0xff] }
 0x11a   :  { %952 = vst.msk [vmem:[#allocation2 + $0x78] sm:$0xff] %vm26_vm12, %v1789_v38  ;;  %509 = vperm.xlu1 %1287, %v1770_v24   ;;  %859 = vmatpush.bf16.msra.mxu0 %v1208_v34  ;;  %v414_v41 = vsub.f32 %v1781_v30, %v1789_v38  ;;  %v1205_v30 = vld [vmem:[%s2055_s2 + $0x8] sm:$0xff] }
 0x11b   :  { %v437_v23 = vmul.f32 1.442695, %v410_v12  ;;  %v1856_v3 = vpop.eup %1309  ;;  %v439_v35 = vmul.f32 1.442695, %v411_v26  ;;  %1268 = vmatpush.bf16.msra.mxu1 %v1208_v34  ;;  %1269 = vmatpush.bf16.msra.mxu2 %v1208_v34 }
 0x11c   :  { %v1861_v25 = vpop.eup %1311  ;;  %1270 = vmatpush.bf16.msra.mxu3 %v1208_v34  ;;  %v445_v42 = vmul.f32 1.442695, %v414_v41 }
 0x11d   :  { %1315 = vpow2.f32 %v437_v23  ;;  %v1873_v39 = vpop.eup %1313 }
 0x11e   :  { %v380_v47 = vpop.xlane.xlu2 %379  ;;  %1317 = vpow2.f32 %v439_v35  ;;  %860 = vmatpush.bf16.msra.mxu0 %v1207_v14 }
 0x11f   :  { %v1806_v54 = vmax.f32 %v1803_v46, %v380_v47  ;;  %1271 = vmatpush.bf16.msra.mxu1 %v1207_v14  ;;  %1272 = vmatpush.bf16.msra.mxu2 %v1207_v14 }
 0x120   :  { %1273 = vmatpush.bf16.msra.mxu3 %v1207_v14 }
 0x121   :  { %951 = vst.msk [vmem:[#allocation2 + $0x70] sm:$0xff] %vm26_vm12, %v1806_v54  ;;  %519 = vperm.xlu2 %1288, %v1806_v54   ;;  %710 = vperm.xlu0 %1286, %v1808_v55   ;;  %v413_v33 = vsub.f32 %v1803_v46, %v1806_v54  ;;  %v1206_v46 = vld [vmem:[%s2055_s2 + $0x10] sm:$0xff] }
 0x122   :  { %524 = vperm.xlu1 %1287, %v1789_v38   ;;  %861 = vmatpush.bf16.msra.mxu0 %v1206_v46  ;;  %v1204_v38 = vld [vmem:[%s2055_s2] sm:$0xff] }
 0x123   :  { %v443_v36 = vmul.f32 1.442695, %v413_v33  ;;  %v1878_v24 = vpop.eup %1315  ;;  %1274 = vmatpush.bf16.msra.mxu1 %v1206_v46  ;;  %1275 = vmatpush.bf16.msra.mxu2 %v1206_v46 }
 0x124   :  { %v1887_v0 = vpop.eup %1317  ;;  %1276 = vmatpush.bf16.msra.mxu3 %v1206_v46 }
 0x125   :  { %1319 = vpow2.f32 %v443_v36 }
 0x126   :  { %1321 = vpow2.f32 %v445_v42  ;;  %862 = vmatpush.bf16.msra.mxu0 %v1205_v30 }
 0x127   :  { %1277 = vmatpush.bf16.msra.mxu1 %v1205_v30  ;;  %1278 = vmatpush.bf16.msra.mxu2 %v1205_v30 }
 0x128   :  { %1279 = vmatpush.bf16.msra.mxu3 %v1205_v30 }
 0x129   :  { %690 = vperm.xlu2 %1288, %v1821_v52   ;;  %725 = vperm.xlu0 %1286, %v1823_v4  }
 0x12a   :  { %695 = vperm.xlu1 %1287, %v1825_v5   ;;  %863 = vmatpush.bf16.msra.mxu0 %v1204_v38 }
 0x12b   :  { %v1889_v40 = vpop.eup %1319  ;;  %1280 = vmatpush.bf16.msra.mxu1 %v1204_v38  ;;  %1281 = vmatpush.bf16.msra.mxu2 %v1204_v38 }
 0x12c   :  { %v1899_v47 = vpop.eup %1321  ;;  %1282 = vmatpush.bf16.msra.mxu3 %v1204_v38 }
 0x131   :  { %705 = vperm.xlu2 %1288, %v1835_v10   ;;  %740 = vperm.xlu0 %1286, %v1837_v18  }
 0x132   :  { %715 = vperm.xlu1 %1287, %v1839_v53  }
 0x139   :  { %755 = vperm.xlu0 %1286, %v1856_v3   ;;  %720 = vperm.xlu2 %1288, %v1854_v21  }
 0x13a   :  { %730 = vperm.xlu1 %1287, %v1861_v25  }
 0x141   :  { %735 = vperm.xlu2 %1288, %v1873_v39  }
 0x142   :  { %745 = vperm.xlu1 %1287, %v1878_v24  }
 0x149   :  { %750 = vperm.xlu2 %1288, %v1887_v0  }
 0x14a   :  { %760 = vperm.xlu1 %1287, %v1889_v40  }
 0x151   :  { %765 = vperm.xlu2 %1288, %v1899_v47  }
 0x153   :  { %v455_v48 = vpop.permute.xlu2 %454 }
 0x154   :  { %v528_v54 = vsub.f32 %v1526_v1, %v455_v48 }
 0x156   :  { %v545_v51 = vmul.f32 1.442695, %v528_v54 }
 0x158   :  { %1323 = vpow2.f32 %v545_v51 }
 0x15e   :  { %v1324_v17 = vpop.eup %1323 }
 0x163   :  { %v450_v45 = vpop.permute.xlu1 %449  ;;  %v475_v59 = vpop.permute.xlu2 %474 }
 0x164   :  { %v527_v50 = vsub.f32 %v1506_v44, %v450_v45  ;;  %v460_v61 = vpop.permute.xlu0 %459  ;;  %v532_v63 = vsub.f32 %v1604_v49, %v475_v59 }
 0x165   :  { %v529_v60 = vsub.f32 %v1504_v43, %v460_v61 }
 0x166   :  { %v543_v8 = vmul.f32 1.442695, %v527_v50  ;;  %v553_v6 = vmul.f32 1.442695, %v532_v63 }
 0x167   :  { %v547_v2 = vmul.f32 1.442695, %v529_v60 }
 0x168   :  { %1325 = vpow2.f32 %v543_v8 }
 0x169   :  { %1327 = vpow2.f32 %v547_v2 }
 0x16a   :  { %1329 = vpow2.f32 %v553_v6 }
 0x16b   :  { %v490_v11 = vpop.permute.xlu2 %489 }
 0x16c   :  { %v470_v7 = vpop.permute.xlu0 %469  ;;  %v535_v23 = vsub.f32 %v1649_v13, %v490_v11 }
 0x16d   :  { %v531_v1 = vsub.f32 %v1518_v57, %v470_v7 }
 0x16e   :  { %v1326_v62 = vpop.eup %1325  ;;  %v559_v36 = vmul.f32 1.442695, %v535_v23 }
 0x16f   :  { %v551_v12 = vmul.f32 1.442695, %v531_v1  ;;  %607 = vadd.xlane.f32.xlu0 %v1326_v62  ;;  %v784_v44 = vpack.c.bf16 %v1324_v17, %v1326_v62  ;;  %v1328_v43 = vpop.eup %1327 }
 0x170   :  { %v1330_v9 = vpop.eup %1329 }
 0x171   :  { %1331 = vpow2.f32 %v551_v12  ;;  %864 = vmatmul.bf16.vlgmr.msra.gmra.mxu0 %v784_v44 }
 0x173   :  { %v465_v19 = vpop.permute.xlu1 %464  ;;  %v505_v57 = vpop.permute.xlu2 %504 }
 0x174   :  { %v530_v20 = vsub.f32 %v1563_v28, %v465_v19  ;;  %611 = vadd.xlane.f32.xlu1 %v1328_v43  ;;  %v485_v49 = vpop.permute.xlu0 %484  ;;  %v538_v28 = vsub.f32 %v1673_v31, %v505_v57 }
 0x175   :  { %v534_v34 = vsub.f32 %v1559_v27, %v485_v49 }
 0x176   :  { %v549_v26 = vmul.f32 1.442695, %v530_v20  ;;  %v565_v48 = vmul.f32 1.442695, %v538_v28 }
 0x177   :  { %v1332_v33 = vpop.eup %1331  ;;  %v557_v14 = vmul.f32 1.442695, %v534_v34 }
 0x178   :  { %1333 = vpow2.f32 %v549_v26  ;;  %v786_v35 = vpack.c.bf16 %v1330_v9, %v1332_v33 }
 0x179   :  { %1335 = vpow2.f32 %v559_v36 }
 0x17a   :  { %874 = vmatmul.bf16.vlgmr.msra.gmra.mxu1 %v786_v35  ;;  %609 = vadd.xlane.f32.xlu2 %v1324_v17  ;;  %1337 = vpow2.f32 %v557_v14 }
 0x17b   :  { %v520_v27 = vpop.permute.xlu2 %519 }
 0x17c   :  { %v480_v41 = vpop.permute.xlu1 %479  ;;  %617 = vadd.xlane.f32.xlu1 %v1330_v9  ;;  %v500_v42 = vpop.permute.xlu0 %499  ;;  %v541_v31 = vsub.f32 %v1679_v22, %v520_v27 }
 0x17d   :  { %v533_v13 = vsub.f32 %v1567_v29, %v480_v41  ;;  %v537_v51 = vsub.f32 %v1615_v56, %v500_v42 }
 0x17e   :  { %v1334_v46 = vpop.eup %1333  ;;  %v571_v6 = vmul.f32 1.442695, %v541_v31 }
 0x17f   :  { %v555_v30 = vmul.f32 1.442695, %v533_v13  ;;  %613 = vadd.xlane.f32.xlu0 %v1334_v46  ;;  %v785_v38 = vpack.c.bf16 %v1334_v46, %v1328_v43  ;;  %v1336_v54 = vpop.eup %1335  ;;  %v563_v60 = vmul.f32 1.442695, %v537_v51 }
 0x180   :  { %v1338_v59 = vpop.eup %1337 }
 0x181   :  { %1339 = vpow2.f32 %v555_v30  ;;  %869 = vmatmul.bf16.gmra.mxu0 %v785_v38  ;;  %v575_v38 = vld [vmem:[#allocation3] sm:$0xff] }
 0x182   :  { %615 = vadd.xlane.f32.xlu2 %v1332_v33  ;;  %1341 = vpow2.f32 %v565_v48  ;;  %v591_v27 = vmul.f32 %v1821_v52, %v575_v38  ;;  %v586_v38 = vld [vmem:[#allocation3 + $0x58] sm:$0xff] }
 0x183   :  { %v1920_v33 = vpop.permute.xlu2 %690 }
 0x184   :  { %v495_v45 = vpop.permute.xlu1 %494  ;;  %623 = vadd.xlane.f32.xlu1 %v1336_v54  ;;  %v515_v50 = vpop.permute.xlu0 %514 }
 0x185   :  { %v536_v29 = vsub.f32 %v1619_v58, %v495_v45  ;;  %v540_v63 = vsub.f32 %v1655_v15, %v515_v50  ;;  %v577_v45 = vld [vmem:[#allocation3 + $0x10] sm:$0xff] }
 0x187   :  { %v1340_v61 = vpop.eup %1339  ;;  %v561_v8 = vmul.f32 1.442695, %v536_v29  ;;  %v569_v7 = vmul.f32 1.442695, %v540_v63  ;;  %v593_v29 = vmul.f32 %v1786_v37, %v577_v45 }
 0x188   :  { %619 = vadd.xlane.f32.xlu0 %v1340_v61  ;;  %v787_v2 = vpack.c.bf16 %v1338_v59, %v1340_v61  ;;  %v1342_v56 = vpop.eup %1341  ;;  %v576_v61 = vld [vmem:[#allocation3 + $0x8] sm:$0xff] }
 0x189   :  { %1343 = vpow2.f32 %v561_v8  ;;  %v592_v8 = vmul.f32 %v1825_v5, %v576_v61  ;;  %v584_v61 = vld [vmem:[#allocation3 + $0x48] sm:$0xff] }
 0x18a   :  { %879 = vmatmul.bf16.gmra.mxu1 %v787_v2  ;;  %621 = vadd.xlane.f32.xlu2 %v1338_v59  ;;  %1345 = vpow2.f32 %v563_v60  ;;  %v580_v60 = vld [vmem:[#allocation3 + $0x28] sm:$0xff] }
 0x18b   :  { %1347 = vpow2.f32 %v571_v6  ;;  %v1926_v34 = vpop.permute.xlu2 %705  ;;  %v596_v6 = vmul.f32 %v1839_v53, %v580_v60 }
 0x18c   :  { %v510_v17 = vpop.permute.xlu1 %509  ;;  %629 = vadd.xlane.f32.xlu1 %v1342_v56  ;;  %1349 = vpow2.f32 %v569_v7  ;;  %v1918_v26 = vpop.permute.xlu0 %700 }
 0x18d   :  { %v539_v58 = vsub.f32 %v1657_v16, %v510_v17 }
 0x18f   :  { %v1344_v22 = vpop.eup %1343  ;;  %v567_v1 = vmul.f32 1.442695, %v539_v58  ;;  %v579_v58 = vld [vmem:[#allocation3 + $0x20] sm:$0xff] }
 0x190   :  { %625 = vadd.xlane.f32.xlu0 %v1344_v22  ;;  %v788_v62 = vpack.c.bf16 %v1344_v22, %v1336_v54  ;;  %v1346_v15 = vpop.eup %1345 }
 0x191   :  { %1351 = vpow2.f32 %v567_v1  ;;  %v1348_v11 = vpop.eup %1347  ;;  %v789_v23 = vpack.c.bf16 %v1342_v56, %v1346_v15  ;;  %v578_v56 = vld [vmem:[#allocation3 + $0x18] sm:$0xff] }
 0x192   :  { %884 = vmatmul.bf16.vlgmr.msra.gmra.mxu2 %v788_v62  ;;  %627 = vadd.xlane.f32.xlu2 %v1346_v15  ;;  %v1350_v43 = vpop.eup %1349  ;;  %v594_v37 = vmul.f32 %v1835_v10, %v578_v56  ;;  %v583_v15 = vld [vmem:[#allocation3 + $0x40] sm:$0xff]  ;;  %v581_v10 = vld [vmem:[#allocation3 + $0x30] sm:$0xff] }
 0x193   :  { %v1932_v14 = vpop.permute.xlu2 %720 }
 0x194   :  { %v525_v12 = vpop.permute.xlu1 %524  ;;  %635 = vadd.xlane.f32.xlu1 %v1348_v11 }
 0x195   :  { %v542_v44 = vsub.f32 %v1675_v32, %v525_v12  ;;  %v1924_v32 = vpop.permute.xlu0 %710 }
 0x197   :  { %v1352_v19 = vpop.eup %1351  ;;  %v573_v20 = vmul.f32 1.442695, %v542_v44  ;;  %v599_v44 = vmul.f32 %v1861_v25, %v583_v15 }
 0x198   :  { %631 = vadd.xlane.f32.xlu0 %v1352_v19  ;;  %v790_v49 = vpack.c.bf16 %v1350_v43, %v1352_v19 }
 0x199   :  { %1353 = vpow2.f32 %v573_v20 }
 0x19a   :  { %894 = vmatmul.bf16.vlgmr.msra.gmra.mxu3 %v790_v49  ;;  %633 = vadd.xlane.f32.xlu2 %v1350_v43 }
 0x19b   :  { %v1938_v28 = vpop.permute.xlu2 %735 }
 0x19c   :  { %v1922_v57 = vpop.permute.xlu1 %695 }
 0x19d   :  { %v1930_v36 = vpop.permute.xlu0 %725 }
 0x19f   :  { %v1354_v16 = vpop.eup %1353 }
 0x1a0   :  { %637 = vadd.xlane.f32.xlu0 %v1354_v16  ;;  %v791_v9 = vpack.c.bf16 %v1354_v16, %v1348_v11  ;;  %v595_v11 = vmul.f32 %v1808_v55, %v579_v58  ;;  %v582_v16 = vld [vmem:[#allocation3 + $0x38] sm:$0xff]  ;;  %v597_v55 = vmul.f32 %v1854_v21, %v581_v10 }
 0x1a1   :  { %v598_v25 = vmul.f32 %v1823_v4, %v582_v16  ;;  %v585_v4 = vld [vmem:[#allocation3 + $0x50] sm:$0xff] }
 0x1a2   :  { %889 = vmatmul.bf16.gmra.mxu2 %v789_v23 }
 0x1a3   :  { %v1944_v30 = vpop.permute.xlu2 %750 }
 0x1a4   :  { %v1928_v35 = vpop.permute.xlu1 %715 }
 0x1a5   :  { %v1936_v42 = vpop.permute.xlu0 %740 }
 0x1aa   :  { %899 = vmatmul.bf16.gmra.mxu3 %v791_v9 }
 0x1ab   :  { %v1949_v31 = vpop.permute.xlu2 %765 }
 0x1ac   :  { %v1934_v41 = vpop.permute.xlu1 %730 }
 0x1ad   :  { %v1942_v46 = vpop.permute.xlu0 %755 }
 0x1b4   :  { %v1940_v13 = vpop.permute.xlu1 %745 }
 0x1bc   :  { %v1946_v48 = vpop.permute.xlu1 %760 }
 0x1e2   :  { %v608_v54 = vpop.xlane.xlu0 %607 }
 0x1e3   :  { %v639_v51 = vadd.f32 %v608_v54, %v591_v27 }
 0x1e5   :  { %656 = vst.msk [vmem:[#allocation3] sm:$0xff] %vm26_vm12, %v639_v51 }
 0x1e7   :  { %v612_v50 = vpop.xlane.xlu1 %611 }
 0x1e8   :  { %v641_v59 = vadd.f32 %v612_v50, %v593_v29  ;;  %v602_v50 = vmul.f32 %v1878_v24, %v586_v38  ;;  %v589_v24 = vld [vmem:[#allocation3 + $0x70] sm:$0xff] }
 0x1ea   :  { %658 = vst.msk [vmem:[#allocation3 + $0x10] sm:$0xff] %vm26_vm12, %v641_v59 }
 0x1ec   :  { %v956_v63 = vld [vmem:[#allocation3] sm:$0xff] }
 0x1ed   :  { %v610_v2 = vpop.xlane.xlu2 %609  ;;  %1355 = vrcp.f32 %v956_v63 }
 0x1ee   :  { %v640_v52 = vadd.f32 %v610_v2, %v592_v8  ;;  %v600_v2 = vmul.f32 %v1873_v39, %v584_v61  ;;  %v587_v39 = vld [vmem:[#allocation3 + $0x60] sm:$0xff] }
 0x1ef   :  { %v618_v7 = vpop.xlane.xlu1 %617 }
 0x1f0   :  { %657 = vst.msk [vmem:[#allocation3 + $0x8] sm:$0xff] %vm26_vm12, %v640_v52  ;;  %v644_v17 = vadd.f32 %v618_v7, %v596_v6  ;;  %v601_v7 = vmul.f32 %v1837_v18, %v585_v4  ;;  %v588_v18 = vld [vmem:[#allocation3 + $0x68] sm:$0xff] }
 0x1f1   :  { %v958_v22 = vld [vmem:[#allocation3 + $0x10] sm:$0xff]  ;;  %v604_v10 = vmul.f32 %v1856_v3, %v588_v18 }
 0x1f2   :  { %661 = vst.msk [vmem:[#allocation3 + $0x28] sm:$0xff] %vm26_vm12, %v644_v17  ;;  %v614_v1 = vpop.xlane.xlu0 %613  ;;  %1357 = vrcp.f32 %v958_v22 }
 0x1f3   :  { %v1356_v5 = vpop.eup %1355  ;;  %v642_v62 = vadd.f32 %v614_v1, %v594_v37  ;;  %v605_v1 = vmul.f32 %v1889_v40, %v589_v24 }
 0x1f4   :  { %1006 = vperm.xlu0 %1286, %v1356_v5  }
 0x1f5   :  { %659 = vst.msk [vmem:[#allocation3 + $0x18] sm:$0xff] %vm26_vm12, %v642_v62  ;;  %v616_v53 = vpop.xlane.xlu2 %615 }
 0x1f6   :  { %v643_v12 = vadd.f32 %v616_v53, %v595_v11 }
 0x1f7   :  { %v624_v43 = vpop.xlane.xlu1 %623  ;;  %v957_v19 = vld [vmem:[#allocation3 + $0x8] sm:$0xff] }
 0x1f8   :  { %v1358_v20 = vpop.eup %1357  ;;  %660 = vst.msk [vmem:[#allocation3 + $0x20] sm:$0xff] %vm26_vm12, %v643_v12  ;;  %v647_v49 = vadd.f32 %v624_v43, %v599_v44  ;;  %1359 = vrcp.f32 %v957_v19  ;;  %v603_v12 = vmul.f32 %v1887_v0, %v587_v39 }
 0x1f9   :  { %1016 = vperm.xlu2 %1288, %v1358_v20   ;;  %v961_v23 = vld [vmem:[#allocation3 + $0x28] sm:$0xff] }
 0x1fa   :  { %664 = vst.msk [vmem:[#allocation3 + $0x40] sm:$0xff] %vm26_vm12, %v647_v49  ;;  %1361 = vrcp.f32 %v961_v23  ;;  %v590_v23 = vld [vmem:[#allocation3 + $0x78] sm:$0xff] }
 0x1fb   :  { %v620_v9 = vpop.xlane.xlu0 %619  ;;  %v606_v38 = vmul.f32 %v1899_v47, %v590_v23 }
 0x1fc   :  { %v645_v27 = vadd.f32 %v620_v9, %v597_v55  ;;  %v959_v54 = vld [vmem:[#allocation3 + $0x18] sm:$0xff] }
 0x1fd   :  { %v622_v51 = vpop.xlane.xlu2 %621  ;;  %1363 = vrcp.f32 %v959_v54 }
 0x1fe   :  { %v1360_v45 = vpop.eup %1359  ;;  %662 = vst.msk [vmem:[#allocation3 + $0x30] sm:$0xff] %vm26_vm12, %v645_v27  ;;  %v646_v29 = vadd.f32 %v622_v51, %v598_v25 }
 0x1ff   :  { %v630_v59 = vpop.xlane.xlu1 %629  ;;  %1011 = vperm.xlu1 %1287, %v1360_v45   ;;  %v960_v60 = vld [vmem:[#allocation3 + $0x20] sm:$0xff] }
 0x200   :  { %v1362_v21 = vpop.eup %1361  ;;  %663 = vst.msk [vmem:[#allocation3 + $0x38] sm:$0xff] %vm26_vm12, %v646_v29  ;;  %v650_v8 = vadd.f32 %v630_v59, %v602_v50  ;;  %1365 = vrcp.f32 %v960_v60  ;;  %v865_v60 = vpop.f32.mrf.mxu0 }
 0x201   :  { %1031 = vperm.xlu2 %1288, %v1362_v21   ;;  %v964_v63 = vld [vmem:[#allocation3 + $0x40] sm:$0xff] }
 0x202   :  { %667 = vst.msk [vmem:[#allocation3 + $0x58] sm:$0xff] %vm26_vm12, %v650_v8  ;;  %1367 = vrcp.f32 %v964_v63  ;;  %v875_v8 = vpop.f32.mrf.mxu1 }
 0x203   :  { %v1364_v52 = vpop.eup %1363  ;;  %v626_v6 = vpop.xlane.xlu0 %625 }
 0x204   :  { %v648_v56 = vadd.f32 %v626_v6, %v600_v2  ;;  %1021 = vperm.xlu0 %1286, %v1364_v52   ;;  %v768_v6 = vmul.f32 0.0, %v1920_v33  ;;  %v773_v33 = vmul.f32 0.0, %v1928_v35 }
 0x205   :  { %v628_v17 = vpop.xlane.xlu2 %627  ;;  %v962_v37 = vld [vmem:[#allocation3 + $0x30] sm:$0xff] }
 0x206   :  { %v1366_v58 = vpop.eup %1365  ;;  %665 = vst.msk [vmem:[#allocation3 + $0x48] sm:$0xff] %vm26_vm12, %v648_v56  ;;  %v649_v22 = vadd.f32 %v628_v17, %v601_v7  ;;  %1369 = vrcp.f32 %v962_v37  ;;  %v905_v56 = vadd.f32 %v865_v60, %v768_v6  ;;  %v769_v17 = vmul.f32 0.0, %v1922_v57 }
 0x207   :  { %v636_v5 = vpop.xlane.xlu1 %635  ;;  %1026 = vperm.xlu1 %1287, %v1366_v58   ;;  %v963_v62 = vld [vmem:[#allocation3 + $0x38] sm:$0xff]  ;;  %v770_v58 = vmul.f32 0.0, %v1918_v26  ;;  %v771_v57 = vmul.f32 0.0, %v1926_v34 }
 0x208   :  { %v1368_v15 = vpop.eup %1367  ;;  %666 = vst.msk [vmem:[#allocation3 + $0x50] sm:$0xff] %vm26_vm12, %v649_v22  ;;  %v653_v11 = vadd.f32 %v636_v5, %v605_v1  ;;  %1371 = vrcp.f32 %v963_v62  ;;  %v867_v21 = vpop.f32.mrf.mxu0  ;;  %v1992_v5 = vld [vmem:[%s2056_s4] ss:$0 sm:$0xff] }
 0x209   :  { %1046 = vperm.xlu2 %1288, %v1368_v15   ;;  %v967_v53 = vld [vmem:[#allocation3 + $0x58] sm:$0xff]  ;;  %v906_v1 = vadd.f32 %v867_v21, %v769_v17 }
 0x20a   :  { %670 = vst.msk [vmem:[#allocation3 + $0x70] sm:$0xff] %vm26_vm12, %v653_v11  ;;  %1373 = vrcp.f32 %v967_v53  ;;  %v877_v52 = vpop.f32.mrf.mxu1 }
 0x20b   :  { %v632_v44 = vpop.xlane.xlu0 %631  ;;  %v910_v26 = vadd.f32 %v877_v52, %v773_v33 }
 0x20c   :  { %v1370_v40 = vpop.eup %1369  ;;  %v651_v43 = vadd.f32 %v632_v44, %v603_v12 }
 0x20d   :  { %1036 = vperm.xlu0 %1286, %v1370_v40   ;;  %v634_v19 = vpop.xlane.xlu2 %633  ;;  %v965_v20 = vld [vmem:[#allocation3 + $0x48] sm:$0xff] }
 0x20e   :  { %v1372_v49 = vpop.eup %1371  ;;  %668 = vst.msk [vmem:[#allocation3 + $0x60] sm:$0xff] %vm26_vm12, %v651_v43  ;;  %v652_v16 = vadd.f32 %v634_v19, %v604_v10  ;;  %1375 = vrcp.f32 %v965_v20  ;;  %v772_v10 = vmul.f32 0.0, %v1924_v32 }
 0x20f   :  { %1041 = vperm.xlu1 %1287, %v1372_v49   ;;  %v966_v55 = vld [vmem:[#allocation3 + $0x50] sm:$0xff] }
 0x210   :  { %v1374_v9 = vpop.eup %1373  ;;  %669 = vst.msk [vmem:[#allocation3 + $0x68] sm:$0xff] %vm26_vm12, %v652_v16  ;;  %1377 = vrcp.f32 %v966_v55  ;;  %v870_v2 = vpop.f32.mrf.mxu0 }
 0x211   :  { %1061 = vperm.xlu2 %1288, %v1374_v9   ;;  %v970_v0 = vld [vmem:[#allocation3 + $0x70] sm:$0xff]  ;;  %v907_v39 = vadd.f32 %v870_v2, %v770_v58  ;;  %v909_v9 = vadd.f32 %v875_v8, %v772_v10 }
 0x212   :  { %1379 = vrcp.f32 %v970_v0  ;;  %v880_v53 = vpop.f32.mrf.mxu1 }
 0x213   :  { %v638_v3 = vpop.xlane.xlu0 %637 }
 0x214   :  { %v1376_v27 = vpop.eup %1375  ;;  %v654_v25 = vadd.f32 %v638_v3, %v606_v38 }
 0x215   :  { %1051 = vperm.xlu0 %1286, %v1376_v27   ;;  %v968_v54 = vld [vmem:[#allocation3 + $0x60] sm:$0xff]  ;;  %v1982_v4 = vpop.f32.mrf.mxu2 }
 0x216   :  { %v1378_v51 = vpop.eup %1377  ;;  %671 = vst.msk [vmem:[#allocation3 + $0x78] sm:$0xff] %vm26_vm12, %v654_v25  ;;  %1381 = vrcp.f32 %v968_v54 }
 0x217   :  { %1056 = vperm.xlu1 %1287, %v1378_v51   ;;  %v969_v45 = vld [vmem:[#allocation3 + $0x68] sm:$0xff]  ;;  %v774_v51 = vmul.f32 0.0, %v1932_v14 }
 0x218   :  { %v1380_v29 = vpop.eup %1379  ;;  %1383 = vrcp.f32 %v969_v45  ;;  %v872_v15 = vpop.f32.mrf.mxu0 }
 0x219   :  { %1076 = vperm.xlu2 %1288, %v1380_v29   ;;  %v908_v40 = vadd.f32 %v872_v15, %v771_v57 }
 0x21a   :  { %v882_v29 = vpop.f32.mrf.mxu1 }
 0x21c   :  { %v1382_v50 = vpop.eup %1381 }
 0x21d   :  { %1066 = vperm.xlu0 %1286, %v1382_v50   ;;  %v971_v59 = vld [vmem:[#allocation3 + $0x78] sm:$0xff]  ;;  %v1985_v7 = vpop.f32.mrf.mxu2  ;;  %v1998_v43 = vpop.f32.mrf.mxu3 }
 0x21e   :  { %v1384_v61 = vpop.eup %1383  ;;  %1385 = vrcp.f32 %v971_v59  ;;  %v775_v59 = vmul.f32 0.0, %v1930_v36 }
 0x21f   :  { %1071 = vperm.xlu1 %1287, %v1384_v61   ;;  %v911_v61 = vadd.f32 %v880_v53, %v774_v51 }
 0x220   :  { %v912_v2 = vadd.f32 %v882_v29, %v775_v59 }
 0x224   :  { %v1386_v47 = vpop.eup %1385 }
 0x225   :  { %1081 = vperm.xlu0 %1286, %v1386_v47   ;;  %v890_v16 = vpop.f32.mrf.mxu2  ;;  %v897_v21 = vpop.f32.mrf.mxu3 }
 0x22d   :  { %v892_v6 = vpop.f32.mrf.mxu2 }
 0x253   :  { %v1017_v63 = vpop.permute.xlu2 %1016 }
 0x254   :  { %v1086_v12 = vmul.f32 %v1017_v63, %v907_v39  ;;  %v776_v63 = vmul.f32 0.0, %v1934_v41 }
 0x256   :  { %v1106_v23 = vadd.f32 %v1992_v5, %v1086_v12  ;;  %v913_v36 = vadd.f32 %v1982_v4, %v776_v63 }
 0x258   :  { %v1122_v25 = vmax.f32 %v1106_v23, 0.0 }
 0x25b   :  { %v1032_v22 = vpop.permute.xlu2 %1031 }
 0x25c   :  { %v1089_v19 = vmul.f32 %v1032_v22, %v910_v26  ;;  %v777_v22 = vmul.f32 0.0, %v1938_v28  ;;  %v900_v26 = vpop.f32.mrf.mxu3 }
 0x25e   :  { %v1109_v27 = vadd.f32 %v1992_v5, %v1089_v19 }
 0x260   :  { %v1125_v47 = vmax.f32 %v1109_v27, 0.0 }
 0x263   :  { %v1047_v0 = vpop.permute.xlu2 %1046 }
 0x266   :  { %v1007_v24 = vpop.permute.xlu0 %1006 }
 0x267   :  { %v1084_v37 = vmul.f32 %v1007_v24, %v905_v56  ;;  %v779_v56 = vmul.f32 0.0, %v1940_v13  ;;  %v914_v13 = vadd.f32 %v1985_v7, %v777_v22 }
 0x269   :  { %v1104_v11 = vadd.f32 %v1992_v5, %v1084_v37  ;;  %v916_v41 = vadd.f32 %v892_v6, %v779_v56 }
 0x26b   :  { %v1120_v20 = vmax.f32 %v1104_v11, 0.0  ;;  %v1062_v58 = vpop.permute.xlu2 %1061 }
 0x26c   :  { %v1095_v33 = vmul.f32 %v1062_v58, %v916_v41 }
 0x26e   :  { %v1115_v28 = vadd.f32 %v1992_v5, %v1095_v33 }
 0x271   :  { %v1012_v62 = vpop.permute.xlu1 %1011 }
 0x272   :  { %v1085_v18 = vmul.f32 %v1012_v62, %v906_v1  ;;  %v1092_v1 = vmul.f32 %v1047_v0, %v913_v36  ;;  %v778_v62 = vmul.f32 0.0, %v1936_v42 }
 0x274   :  { %v1105_v44 = vadd.f32 %v1992_v5, %v1085_v18  ;;  %v915_v18 = vadd.f32 %v890_v16, %v778_v62  ;;  %v1112_v57 = vadd.f32 %v1992_v5, %v1092_v1  ;;  %v1131_v16 = vmax.f32 %v1115_v28, 0.0 }
 0x276   :  { %v1121_v49 = vmax.f32 %v1105_v44, 0.0  ;;  %v1022_v35 = vpop.permute.xlu0 %1021  ;;  %v1128_v10 = vmax.f32 %v1112_v57, 0.0 }
 0x277   :  { %v1087_v55 = vmul.f32 %v1022_v35, %v908_v40  ;;  %v780_v40 = vmul.f32 0.0, %v1944_v30 }
 0x278   :  { %v1215_v34 = vpack.c.bf16 %v1121_v49, %v1120_v20  ;;  %v781_v49 = vmul.f32 0.0, %v1942_v46 }
 0x279   :  { %v1107_v38 = vadd.f32 %v1992_v5, %v1087_v55  ;;  %v1027_v3 = vpop.permute.xlu1 %1026  ;;  %v917_v35 = vadd.f32 %v1998_v43, %v780_v40 }
 0x27a   :  { %1216 = vst [vmem:[%s2057_s5] sm:$0xff] %v1215_v34   ;;  %v1088_v32 = vmul.f32 %v1027_v3, %v909_v9  ;;  %v782_v34 = vmul.f32 0.0, %v1946_v48  ;;  %v918_v0 = vadd.f32 %v897_v21, %v781_v49  ;;  %v1077_v3 = vpop.permute.xlu2 %1076  ;;  %v783_v48 = vmul.f32 0.0, %v1949_v31 }
 0x27b   :  { %v1123_v54 = vmax.f32 %v1107_v38, 0.0 }
 0x27c   :  { %v1108_v45 = vadd.f32 %v1992_v5, %v1088_v32  ;;  %v919_v32 = vadd.f32 %v900_v26, %v782_v34 }
 0x27d   :  { %v1220_v50 = vpack.c.bf16 %v1123_v54, %v1122_v25  ;;  %v902_v25 = vpop.f32.mrf.mxu3 }
 0x27e   :  { %v1124_v60 = vmax.f32 %v1108_v45, 0.0  ;;  %v1098_v54 = vmul.f32 %v1077_v3, %v919_v32  ;;  %v920_v45 = vadd.f32 %v902_v25, %v783_v48 }
 0x27f   :  { %1252 = vst [vmem:[%s2057_s5 + $0x8] sm:$0xff] %v1220_v50   ;;  %v1037_v8 = vpop.permute.xlu0 %1036 }
 0x280   :  { %v1225_v52 = vpack.c.bf16 %v1125_v47, %v1124_v60  ;;  %v1090_v14 = vmul.f32 %v1037_v8, %v911_v61  ;;  %v1118_v61 = vadd.f32 %v1992_v5, %v1098_v54 }
 0x281   :  { %v1042_v24 = vpop.permute.xlu1 %1041 }
 0x282   :  { %1253 = vst [vmem:[%s2057_s5 + $0x10] sm:$0xff] %v1225_v52   ;;  %v1110_v17 = vadd.f32 %v1992_v5, %v1090_v14  ;;  %v1091_v37 = vmul.f32 %v1042_v24, %v912_v2  ;;  %v1134_v8 = vmax.f32 %v1118_v61, 0.0 }
 0x284   :  { %v1111_v39 = vadd.f32 %v1992_v5, %v1091_v37  ;;  %v1126_v4 = vmax.f32 %v1110_v17, 0.0 }
 0x286   :  { %v1127_v15 = vmax.f32 %v1111_v39, 0.0 }
 0x287   :  { %v1052_v11 = vpop.permute.xlu0 %1051 }
 0x288   :  { %v1230_v53 = vpack.c.bf16 %v1127_v15, %v1126_v4  ;;  %v1093_v12 = vmul.f32 %v1052_v11, %v914_v13 }
 0x289   :  { %v1057_v44 = vpop.permute.xlu1 %1056 }
 0x28a   :  { %1254 = vst [vmem:[%s2057_s5 + $0x18] sm:$0xff] %v1230_v53   ;;  %v1113_v42 = vadd.f32 %v1992_v5, %v1093_v12  ;;  %v1094_v7 = vmul.f32 %v1057_v44, %v915_v18 }
 0x28c   :  { %v1129_v19 = vmax.f32 %v1113_v42, 0.0  ;;  %v1114_v20 = vadd.f32 %v1992_v5, %v1094_v7 }
 0x28e   :  { %v1235_v23 = vpack.c.bf16 %v1129_v19, %v1128_v10  ;;  %v1130_v55 = vmax.f32 %v1114_v20, 0.0 }
 0x28f   :  { %v1067_v9 = vpop.permute.xlu0 %1066 }
 0x290   :  { %1255 = vst [vmem:[%s2057_s5 + $0x20] sm:$0xff] %v1235_v23   ;;  %v1240_v30 = vpack.c.bf16 %v1131_v16, %v1130_v55  ;;  %v1096_v38 = vmul.f32 %v1067_v9, %v917_v35 }
 0x291   :  { %v1072_v27 = vpop.permute.xlu1 %1071 }
 0x292   :  { %1256 = vst [vmem:[%s2057_s5 + $0x28] sm:$0xff] %v1240_v30   ;;  %v1116_v46 = vadd.f32 %v1992_v5, %v1096_v38  ;;  %v1097_v43 = vmul.f32 %v1072_v27, %v918_v0 }
 0x294   :  { %v1117_v51 = vadd.f32 %v1992_v5, %v1097_v43  ;;  %v1132_v29 = vmax.f32 %v1116_v46, 0.0 }
 0x296   :  { %v1133_v50 = vmax.f32 %v1117_v51, 0.0 }
 0x297   :  { %v1082_v59 = vpop.permute.xlu0 %1081 }
 0x298   :  { %v1245_v47 = vpack.c.bf16 %v1133_v50, %v1132_v29  ;;  %v1099_v60 = vmul.f32 %v1082_v59, %v920_v45 }
 0x29a   :  { %1257 = vst [vmem:[%s2057_s5 + $0x30] sm:$0xff] %v1245_v47   ;;  %v1119_v21 = vadd.f32 %v1992_v5, %v1099_v60 }
 0x29c   :  { %v1135_v63 = vmax.f32 %v1119_v21, 0.0 }
 0x29e   :  { %v1250_v31 = vpack.c.bf16 %v1135_v63, %v1134_v8 }
 0x2a0   :  { %1258 = vst [vmem:[%s2057_s5 + $0x38] sm:$0xff] %v1250_v31  }

</bundles_post_ra>
